<compile_context>
chip_gen: v7x
topology: tpu7x:2x2x1
jax: 0.10.0
libtpu: 0.0.40
codegen_flags: <defaults>
</compile_context>

<pallas_src>
from functools import partial

import numpy as np
import jax
import jax.numpy as jnp
from jax.experimental import pallas as pl
from jax.experimental.pallas import tpu as pltpu


# ----------------------------------------------------------------------------
# small helpers
# ----------------------------------------------------------------------------
def _vmem_limit():
    """Generation-aware scoped-VMEM budget (~75% of physical VMEM)."""
    try:
        cap = getattr(pltpu.get_tpu_info(), "vmem_capacity_bytes", None)
        if cap:
            return int(cap * 0.75)
    except Exception:
        pass
    return 48 * 1024 * 1024          # safe fallback (fits v7x's 64 MiB)


def _chunks(total, cap):
    """Static list of (start, size) chunks covering `total` rows."""
    out, start = [], 0
    while start < total:
        size = min(cap, total - start)
        out.append((start, size))
        start += size
    return out


def _maybe_mult(x, m):
    # pl.multiple_of hint only for power-of-two tiles (hint-only, safe to skip)
    return pl.multiple_of(x, m) if (m & (m - 1)) == 0 else x


# ----------------------------------------------------------------------------
# Pallas kernels
# ----------------------------------------------------------------------------
def _stem1_kernel(x_ref, w_ref, b_ref, o_ref, *, tile, wout, cin, cout):
    """3x3 stride-2 conv + folded BN + ReLU, single im2col matmul (K = 9*cin).

    x_ref: (1, Hq, 2, Wq, 2*cin)  phase-split padded input (resident, bf16)
    w_ref: (9*cin, cout)          im2col weight matrix (bf16)
    b_ref: (1, cout)              folded bias (f32)
    o_ref: (1, tile, wout, cout)  output row tile (bf16, real channel width)
    """
    r = pl.program_id(1)
    row0 = _maybe_mult(r * tile, tile)
    cols = []
    for di in range(3):
        for dj in range(3):
            cols.append(x_ref[0,
                              pl.ds(row0 + di // 2, tile),
                              pl.ds(di % 2, 1),
                              pl.ds(dj // 2, wout),
                              pl.ds((dj % 2) * cin, cin)])      # (tile,1,wout,cin)
    patch = jnp.concatenate(cols, axis=-1).reshape(tile * wout, 9 * cin)
    y = jnp.dot(patch, w_ref[...], preferred_element_type=jnp.float32)
    y = jnp.maximum(y + b_ref[...], 0.0)
    o_ref[...] = y.reshape(1, tile, wout, cout).astype(o_ref.dtype)


def _stem2_stage_head_kernel(a1_ref, w2_ref, b2_ref, w3_ref, b3_ref,
                             wh_ref, bh_ref, o_ref, a2_ref,
                             *, tile, h4, w4, c1, c2, ncls, chunk):
    """Fused stem2 (s2) + stage (s1) + 1x1 head.  The stem2 feature map lives
    only in the VMEM scratch `a2_ref`; logits are stored class-major.

    a1_ref: (1, Hq, 2, Wq, 2*c1)   phase-split padded stem1 activation (bf16)
    w2_ref: (9*c1, c2)             stem2 im2col weights (bf16)
    w3_ref: (9*c2, c2)             stage im2col weights (bf16)
    wh_ref: (c2, ncls)             head 1x1 weights (bf16)
    o_ref : (1, ncls, tile, w4)    class-major logits row tile (f32)
    a2_ref: (h4p+2, w4+2, c2)      VMEM scratch, stem2 act with 1-px zero pad
    """
    r = pl.program_id(1)

    @pl.when(r == 0)
    def _compute_stem2():
        a2_ref[...] = jnp.zeros(a2_ref.shape, a2_ref.dtype)
        for r0, c in _chunks(h4, chunk):
            cols = []
            for di in range(3):
                for dj in range(3):
                    cols.append(a1_ref[0,
                                       pl.ds(r0 + di // 2, c),
                                       pl.ds(di % 2, 1),
                                       pl.ds(dj // 2, w4),
                                       pl.ds((dj % 2) * c1, c1)])
            patch = jnp.concatenate(cols, axis=-1).reshape(c * w4, 9 * c1)
            y = jnp.dot(patch, w2_ref[...], preferred_element_type=jnp.float32)
            y = jnp.maximum(y + b2_ref[...], 0.0).astype(a2_ref.dtype)
            a2_ref[pl.ds(1 + r0, c), pl.ds(1, w4), :] = y.reshape(c, w4, c2)

    # stage conv (stride 1) + head on this output-row tile, from VMEM scratch
    row0 = _maybe_mult(r * tile, tile)
    ain = a2_ref[pl.ds(row0, tile + 2), :, :]                   # (tile+2, w4+2, c2)
    cols = []
    for di in range(3):
        for dj in range(3):
            cols.append(ain[di:di + tile, dj:dj + w4, :])       # (tile, w4, c2)
    patch = jnp.concatenate(cols, axis=-1).reshape(tile * w4, 9 * c2)
    h = jnp.dot(patch, w3_ref[...], preferred_element_type=jnp.float32)
    h = jnp.maximum(h + b3_ref[...], 0.0)                       # backbone act (f32)
    logits = jnp.dot(h.astype(jnp.bfloat16), wh_ref[...],
                     preferred_element_type=jnp.float32) + bh_ref[...]
    lgs = logits.reshape(tile, w4, ncls)
    for cc in range(ncls):                                      # class-major store
        o_ref[0, cc, :, :] = lgs[:, :, cc]


def _bilinear_kernel(lg_ref, ah_ref, awt_ref, o_ref):
    """Separable bilinear upsample for one output-row tile, NCHW output.

    lg_ref : (1, C, Hs, Ws) f32 class-major logits (resident)
    ah_ref : (tile, Hs)     H-interp rows for this output-row tile
    awt_ref: (Ws, Wo)       W-interp matrix (transposed)
    o_ref  : (1, C, tile, Wo) f32
    """
    c, hs = lg_ref.shape[1], lg_ref.shape[2]
    wo = awt_ref.shape[1]
    # W-interp for all classes in one matmul (classes stacked along M)
    t = jnp.dot(lg_ref[0].reshape(c * hs, lg_ref.shape[3]), awt_ref[...],
                preferred_element_type=jnp.float32)             # (c*hs, Wo)
    t = t.reshape(c, hs, wo)
    ah = ah_ref[...]
    for cc in range(c):                                         # small static loop
        o_ref[0, cc, :, :] = jnp.dot(ah, t[cc],
                                     preferred_element_type=jnp.float32)


# ----------------------------------------------------------------------------
# pallas_call wrappers
# ----------------------------------------------------------------------------
def stem1_conv(x_nhwc, w1m, b1, *, row_cap=64):
    """x: (N, H, W, Cin) bf16 -> (N, H/2, W/2, C1) bf16 (real channel width)."""
    n, h, w, cin = x_nhwc.shape
    c1 = w1m.shape[1]
    h2, w2 = h // 2, w // 2
    tile = h2 if h2 <= row_cap else row_cap
    r2 = pl.cdiv(h2, tile)
    h2p = r2 * tile
    pad_bot = 1 + 2 * (h2p - h2)
    xp = jnp.pad(x_nhwc, ((0, 0), (1, pad_bot), (1, 1), (0, 0)))
    hq, wq = h2p + 1, w2 + 1
    xps = xp.reshape(n, hq, 2, wq, 2 * cin)       # zero-cost stride-2 phase split

    flops = 2 * n * h2p * w2 * 9 * cin * c1
    bytes_acc = 2 * (n * 2 * hq * wq * 2 * cin + n * h2p * w2 * c1 + 9 * cin * c1)
    out = pl.pallas_call(
        partial(_stem1_kernel, tile=tile, wout=w2, cin=cin, cout=c1),
        out_shape=jax.ShapeDtypeStruct((n, h2p, w2, c1), jnp.bfloat16),
        grid=(n, r2),
        in_specs=[
            pl.BlockSpec((1, hq, 2, wq, 2 * cin), lambda i, r: (i, 0, 0, 0, 0)),
            pl.BlockSpec((9 * cin, c1), lambda i, r: (0, 0)),
            pl.BlockSpec((1, c1), lambda i, r: (0, 0)),
        ],
        out_specs=pl.BlockSpec((1, tile, w2, c1), lambda i, r: (i, r, 0, 0)),
        compiler_params=pltpu.CompilerParams(
            dimension_semantics=("parallel", "parallel"),
            vmem_limit_bytes=_vmem_limit()),
        cost_estimate=pl.CostEstimate(flops=flops, transcendentals=0,
                                      bytes_accessed=bytes_acc),
    )(xps, w1m, b1)
    return out[:, :h2] if h2p != h2 else out


def stem2_stage_head(a1, w2m, b2, w3m, b3, whm, bh, *, row_cap=64, stem2_chunk=64):
    """a1: (N, H/2, W/2, C1) bf16 -> class-major logits (N, ncls, H/4, W/4) f32.

    stem2 + stage + head fused; the stem2 feature map never leaves VMEM.
    """
    n, h2, w2, c1 = a1.shape
    c2 = w2m.shape[1]
    ncls = whm.shape[1]
    h4, w4 = h2 // 2, w2 // 2
    tile = h4 if h4 <= row_cap else row_cap
    r4 = pl.cdiv(h4, tile)
    h4p = r4 * tile

    a1p = jnp.pad(a1, ((0, 0), (1, 1), (1, 1), (0, 0)))
    hq, wq = (h2 + 2) // 2, (w2 + 2) // 2
    a1ps = a1p.reshape(n, hq, 2, wq, 2 * c1)      # stride-2 phase split

    flops = 2 * n * h4 * w4 * 9 * c1 * c2 \
        + 2 * n * h4p * w4 * (9 * c2 * c2 + c2 * ncls)
    bytes_acc = 2 * (n * (h2 + 2) * (w2 + 2) * c1
                     + 9 * c1 * c2 + 9 * c2 * c2 + c2 * ncls) \
        + 4 * n * ncls * h4p * w4
    out = pl.pallas_call(
        partial(_stem2_stage_head_kernel, tile=tile, h4=h4, w4=w4,
                c1=c1, c2=c2, ncls=ncls, chunk=stem2_chunk),
        out_shape=jax.ShapeDtypeStruct((n, ncls, h4p, w4), jnp.float32),
        grid=(n, r4),
        in_specs=[
            pl.BlockSpec((1, hq, 2, wq, 2 * c1), lambda i, r: (i, 0, 0, 0, 0)),
            pl.BlockSpec((9 * c1, c2), lambda i, r: (0, 0)),
            pl.BlockSpec((1, c2), lambda i, r: (0, 0)),
            pl.BlockSpec((9 * c2, c2), lambda i, r: (0, 0)),
            pl.BlockSpec((1, c2), lambda i, r: (0, 0)),
            pl.BlockSpec((c2, ncls), lambda i, r: (0, 0)),
            pl.BlockSpec((1, ncls), lambda i, r: (0, 0)),
        ],
        out_specs=pl.BlockSpec((1, ncls, tile, w4), lambda i, r: (i, 0, r, 0)),
        scratch_shapes=[pltpu.VMEM((h4p + 2, w4 + 2, c2), jnp.bfloat16)],
        compiler_params=pltpu.CompilerParams(
            # row axis carries the VMEM-resident stem2 scratch -> "arbitrary"
            dimension_semantics=("parallel", "arbitrary"),
            vmem_limit_bytes=_vmem_limit()),
        cost_estimate=pl.CostEstimate(flops=flops, transcendentals=0,
                                      bytes_accessed=bytes_acc),
    )(a1ps, w2m, b2, w3m, b3, whm, bh)
    return out[:, :, :h4] if h4p != h4 else out


def bilinear_upsample_nchw(logits, out_hw, *, row_cap=128):
    """(N, C, Hs, Ws) f32 -> (N, C, Ho, Wo) f32, align_corners=False."""
    n, c, hs, ws = logits.shape
    ho, wo = out_hw
    tile = ho if ho <= row_cap else row_cap
    rows = pl.cdiv(ho, tile)
    hop = rows * tile
    a_h = bilinear_matrix(ho, hs)
    if hop != ho:
        a_h = jnp.pad(a_h, ((0, hop - ho), (0, 0)))
    a_wt = jnp.transpose(bilinear_matrix(wo, ws))                # (Ws, Wo)
    out = pl.pallas_call(
        _bilinear_kernel,
        out_shape=jax.ShapeDtypeStruct((n, c, hop, wo), jnp.float32),
        grid=(n, rows),
        in_specs=[
            pl.BlockSpec((1, c, hs, ws), lambda i, r: (i, 0, 0, 0)),
            pl.BlockSpec((tile, hs), lambda i, r: (r, 0)),
            pl.BlockSpec((ws, wo), lambda i, r: (0, 0)),
        ],
        out_specs=pl.BlockSpec((1, c, tile, wo), lambda i, r: (i, 0, r, 0)),
        compiler_params=pltpu.CompilerParams(
            dimension_semantics=("parallel", "parallel"),
            vmem_limit_bytes=_vmem_limit()),
    )(logits, a_h, a_wt)
    return out[:, :, :ho] if hop != ho else out


# ----------------------------------------------------------------------------
# Glue: BN folding, weight prep, bilinear matrices (plain JAX / numpy)
# ----------------------------------------------------------------------------
def fold_bn(w_oihw, gamma, beta, mean, var, eps=1e-5):
    scale = gamma / jnp.sqrt(var + eps)
    return w_oihw * scale[:, None, None, None], beta - mean * scale


def conv_weight_matrix(w_oihw, bias):
    """Folded PyTorch conv weight -> ((kh*kw*Cin, Cout) bf16, (1, Cout) f32)."""
    cout, cin, kh, kw = w_oihw.shape
    wm = jnp.transpose(w_oihw, (2, 3, 1, 0)).reshape(kh * kw * cin, cout)
    return wm.astype(jnp.bfloat16), bias.reshape(1, cout).astype(jnp.float32)


def bilinear_matrix(out_size, in_size):
    # F.interpolate(mode="bilinear", align_corners=False) interpolation matrix.
    d = np.arange(out_size, dtype=np.float64)
    src = (d + 0.5) * (in_size / out_size) - 0.5
    src = np.clip(src, 0.0, in_size - 1)
    lo = np.floor(src).astype(np.int64)
    hi = np.minimum(lo + 1, in_size - 1)
    frac = src - lo
    A = np.zeros((out_size, in_size), np.float32)
    A[np.arange(out_size), lo] += (1.0 - frac).astype(np.float32)
    A[np.arange(out_size), hi] += frac.astype(np.float32)
    return jnp.asarray(A)


# ----------------------------------------------------------------------------
# Parameter init (deterministic, synthetic — no checkpoint load)
# ----------------------------------------------------------------------------
def init_conv_bn(key, cin, cout, k):
    kw_, kg, kb, km, kv = jax.random.split(key, 5)
    fan_in = cin * k * k
    return {
        "w": jax.random.normal(kw_, (cout, cin, k, k), jnp.float32) / np.sqrt(fan_in),
        "gamma": 1.0 + 0.1 * jax.random.normal(kg, (cout,), jnp.float32),
        "beta": 0.1 * jax.random.normal(kb, (cout,), jnp.float32),
        "mean": 0.1 * jax.random.normal(km, (cout,), jnp.float32),
        "var": 1.0 + 0.1 * jnp.abs(jax.random.normal(kv, (cout,), jnp.float32)),
    }


def init_params(key, in_ch=3, width=18, num_classes=8):
    k1, k2, k3, k4, k5 = jax.random.split(key, 5)
    return {
        "stem1": init_conv_bn(k1, in_ch, 16, 3),
        "stem2": init_conv_bn(k2, 16, width, 3),
        "stage": init_conv_bn(k3, width, width, 3),
        "head_w": jax.random.normal(k4, (num_classes, width, 1, 1), jnp.float32)
                  / np.sqrt(width),
        "head_b": 0.1 * jax.random.normal(k5, (num_classes,), jnp.float32),
    }


# ----------------------------------------------------------------------------
# FloorPlanModel forward (NCHW in, NCHW logits out)
# ----------------------------------------------------------------------------
def floorplan_forward(params, x_nchw):
    n, _, h, w = x_nchw.shape
    assert h % 4 == 0 and w % 4 == 0, "spatial dims must be divisible by 4"
    num_classes = params["head_w"].shape[0]
    width = params["stage"]["w"].shape[0]

    x = jnp.transpose(x_nchw, (0, 2, 3, 1)).astype(jnp.bfloat16)   # NHWC bf16

    w1m, b1 = conv_weight_matrix(*fold_bn(
        params["stem1"]["w"], params["stem1"]["gamma"], params["stem1"]["beta"],
        params["stem1"]["mean"], params["stem1"]["var"]))
    w2m, b2 = conv_weight_matrix(*fold_bn(
        params["stem2"]["w"], params["stem2"]["gamma"], params["stem2"]["beta"],
        params["stem2"]["mean"], params["stem2"]["var"]))
    w3m, b3 = conv_weight_matrix(*fold_bn(
        params["stage"]["w"], params["stage"]["gamma"], params["stage"]["beta"],
        params["stage"]["mean"], params["stage"]["var"]))
    whm = jnp.transpose(params["head_w"].reshape(num_classes, width)
                        ).astype(jnp.bfloat16)                     # (width, ncls)
    bh = params["head_b"].reshape(1, num_classes).astype(jnp.float32)

    # HRNet stem conv 1 (stride 2): real-width activation in HBM (no lane padding)
    a1 = stem1_conv(x, w1m, b1)                                    # (N, H/2, W/2, 16)
    # stem conv 2 + (stand-in) stage + 1x1 head, fused; class-major logits
    logits = stem2_stage_head(a1, w2m, b2, w3m, b3, whm, bh)       # (N, ncls, H/4, W/4)
    # fused, row-tiled bilinear upsample straight to NCHW output
    return bilinear_upsample_nchw(logits, (h, w))


# ----------------------------------------------------------------------------
# Pure-JAX reference (same math / same bf16 rounding points, no Pallas)
# ----------------------------------------------------------------------------
def im2col(x_nhwc, kh, kw, stride, pad):
    x = jnp.pad(x_nhwc, ((0, 0), (pad, pad), (pad, pad), (0, 0)))
    N, Hp, Wp, C = x.shape
    Ho = (Hp - kh) // stride + 1
    Wo = (Wp - kw) // stride + 1
    cols = []
    for i in range(kh):
        for j in range(kw):
            cols.append(x[:, i:i + stride * Ho:stride, j:j + stride * Wo:stride, :])
    patches = jnp.concatenate(cols, axis=-1)
    return patches.reshape(N * Ho * Wo, kh * kw * C), (N, Ho, Wo)


def weight_to_matrix(w_oihw):
    Cout, Cin, kh, kw = w_oihw.shape
    return jnp.transpose(w_oihw, (2, 3, 1, 0)).reshape(kh * kw * Cin, Cout)


def _ref_forward(params, x_nchw):
    def conv_ref(x, p, stride, relu=True):
        w, b = fold_bn(p["w"], p["gamma"], p["beta"], p["mean"], p["var"])
        wm = weight_to_matrix(w).astype(jnp.bfloat16)
        patches, (n, ho, wo) = im2col(x, 3, 3, stride, 1)
        out = jnp.dot(patches.astype(jnp.bfloat16), wm,
                      preferred_element_type=jnp.float32) + b[None, :]
        if relu:
            out = jnp.maximum(out, 0.0)
        return out.reshape(n, ho, wo, -1)

    out_hw = x_nchw.shape[2:]
    nc = params["head_w"].shape[0]
    x = jnp.transpose(x_nchw, (0, 2, 3, 1)).astype(jnp.bfloat16)
    a1 = conv_ref(x, params["stem1"], 2).astype(jnp.bfloat16)
    a2 = conv_ref(a1, params["stem2"], 2).astype(jnp.bfloat16)
    h3 = conv_ref(a2, params["stage"], 1)                          # f32
    n, hs, ws, width = h3.shape
    hw = jnp.transpose(params["head_w"].reshape(nc, width)).astype(jnp.bfloat16)
    logits = (jnp.dot(h3.reshape(-1, width).astype(jnp.bfloat16), hw,
                      preferred_element_type=jnp.float32)
              + params["head_b"][None, :]).reshape(n, hs, ws, nc)
    a_h = bilinear_matrix(out_hw[0], hs)
    a_w = bilinear_matrix(out_hw[1], ws)
    hi = jax.lax.Precision.HIGHEST
    up = jnp.einsum("oh,nhwc->nowc", a_h, logits, precision=hi)
    up = jnp.einsum("pw,nowc->nopc", a_w, up, precision=hi)
    return jnp.transpose(up, (0, 3, 1, 2))


# ----------------------------------------------------------------------------
if __name__ == "__main__":
    x = jax.random.normal(jax.random.PRNGKey(0), (2, 3, 16, 16), jnp.float32)
    params = init_params(jax.random.PRNGKey(42))

    out = jax.jit(floorplan_forward)(params, x)
    out = jax.block_until_ready(out)
    assert out.shape == (2, 8, 16, 16), out.shape

    ref = _ref_forward(params, x)
    np.testing.assert_allclose(np.asarray(out, dtype=np.float32),
                               np.asarray(ref, dtype=np.float32),
                               rtol=2e-2, atol=2e-2)
    print("KERNEL_OK")
</pallas_src>

<mosaic_0001>
module attributes {stable_mosaic.version = 11 : i64} {
  func.func @_stem1_kernel(%arg0: i32, %arg1: i32, %arg2: memref<1x9x2x9x6xbf16, #tpu.memory_space<vmem>>, %arg3: memref<27x16xbf16, #tpu.memory_space<vmem>>, %arg4: memref<1x16xf32, #tpu.memory_space<vmem>>, %arg5: memref<1x8x8x16xbf16, #tpu.memory_space<vmem>>) attributes {dimension_semantics = [#tpu.dimension_semantics<parallel>, #tpu.dimension_semantics<parallel>], iteration_bounds = array<i64: 2, 1>, scalar_prefetch = 0 : i64, scratch_operands = 0 : i64, tpu.core_type = #tpu.core_type<tc>, window_params = [{transform_indices = @transform_0, window_bounds = array<i64: 1, 9, 2, 9, 6>}, {pipeline_mode = #tpu.pipeline_mode<synchronous>, transform_indices = @transform_1, window_bounds = array<i64: 27, 16>}, {pipeline_mode = #tpu.pipeline_mode<synchronous>, transform_indices = @transform_2, window_bounds = array<i64: 1, 16>}, {transform_indices = @transform_3, window_bounds = array<i64: 1, 8, 8, 16>}]} {
    %c8_i32 = arith.constant 8 : i32
    %0 = arith.muli %arg1, %c8_i32 : i32
    %1 = tpu.assume_multiple %0, 8 : i32
    %c0_i32 = arith.constant 0 : i32
    %2 = arith.addi %1, %c0_i32 : i32
    %c0 = arith.constant 0 : index
    %3 = arith.index_cast %2 : i32 to index
    %c0_0 = arith.constant 0 : index
    %c0_1 = arith.constant 0 : index
    %c0_2 = arith.constant 0 : index
    %4 = vector.load %arg2[%c0, %3, %c0_0, %c0_1, %c0_2] : memref<1x9x2x9x6xbf16, #tpu.memory_space<vmem>>, vector<1x8x1x8x3xbf16>
    %5 = vector.shape_cast %4 : vector<1x8x1x8x3xbf16> to vector<8x1x8x3xbf16>
    %c0_i32_3 = arith.constant 0 : i32
    %6 = arith.addi %1, %c0_i32_3 : i32
    %c0_4 = arith.constant 0 : index
    %7 = arith.index_cast %6 : i32 to index
    %c0_5 = arith.constant 0 : index
    %c0_6 = arith.constant 0 : index
    %c3 = arith.constant 3 : index
    %8 = vector.load %arg2[%c0_4, %7, %c0_5, %c0_6, %c3] : memref<1x9x2x9x6xbf16, #tpu.memory_space<vmem>>, vector<1x8x1x8x3xbf16>
    %9 = vector.shape_cast %8 : vector<1x8x1x8x3xbf16> to vector<8x1x8x3xbf16>
    %c0_i32_7 = arith.constant 0 : i32
    %10 = arith.addi %1, %c0_i32_7 : i32
    %c0_8 = arith.constant 0 : index
    %11 = arith.index_cast %10 : i32 to index
    %c0_9 = arith.constant 0 : index
    %c1 = arith.constant 1 : index
    %c0_10 = arith.constant 0 : index
    %12 = vector.load %arg2[%c0_8, %11, %c0_9, %c1, %c0_10] : memref<1x9x2x9x6xbf16, #tpu.memory_space<vmem>>, vector<1x8x1x8x3xbf16>
    %13 = vector.shape_cast %12 : vector<1x8x1x8x3xbf16> to vector<8x1x8x3xbf16>
    %c0_i32_11 = arith.constant 0 : i32
    %14 = arith.addi %1, %c0_i32_11 : i32
    %c0_12 = arith.constant 0 : index
    %15 = arith.index_cast %14 : i32 to index
    %c1_13 = arith.constant 1 : index
    %c0_14 = arith.constant 0 : index
    %c0_15 = arith.constant 0 : index
    %16 = vector.load %arg2[%c0_12, %15, %c1_13, %c0_14, %c0_15] : memref<1x9x2x9x6xbf16, #tpu.memory_space<vmem>>, vector<1x8x1x8x3xbf16>
    %17 = vector.shape_cast %16 : vector<1x8x1x8x3xbf16> to vector<8x1x8x3xbf16>
    %c0_i32_16 = arith.constant 0 : i32
    %18 = arith.addi %1, %c0_i32_16 : i32
    %c0_17 = arith.constant 0 : index
    %19 = arith.index_cast %18 : i32 to index
    %c1_18 = arith.constant 1 : index
    %c0_19 = arith.constant 0 : index
    %c3_20 = arith.constant 3 : index
    %20 = vector.load %arg2[%c0_17, %19, %c1_18, %c0_19, %c3_20] : memref<1x9x2x9x6xbf16, #tpu.memory_space<vmem>>, vector<1x8x1x8x3xbf16>
    %21 = vector.shape_cast %20 : vector<1x8x1x8x3xbf16> to vector<8x1x8x3xbf16>
    %c0_i32_21 = arith.constant 0 : i32
    %22 = arith.addi %1, %c0_i32_21 : i32
    %c0_22 = arith.constant 0 : index
    %23 = arith.index_cast %22 : i32 to index
    %c1_23 = arith.constant 1 : index
    %c1_24 = arith.constant 1 : index
    %c0_25 = arith.constant 0 : index
    %24 = vector.load %arg2[%c0_22, %23, %c1_23, %c1_24, %c0_25] : memref<1x9x2x9x6xbf16, #tpu.memory_space<vmem>>, vector<1x8x1x8x3xbf16>
    %25 = vector.shape_cast %24 : vector<1x8x1x8x3xbf16> to vector<8x1x8x3xbf16>
    %c1_i32 = arith.constant 1 : i32
    %26 = arith.addi %1, %c1_i32 : i32
    %c0_26 = arith.constant 0 : index
    %27 = arith.index_cast %26 : i32 to index
    %c0_27 = arith.constant 0 : index
    %c0_28 = arith.constant 0 : index
    %c0_29 = arith.constant 0 : index
    %28 = vector.load %arg2[%c0_26, %27, %c0_27, %c0_28, %c0_29] : memref<1x9x2x9x6xbf16, #tpu.memory_space<vmem>>, vector<1x8x1x8x3xbf16>
    %29 = vector.shape_cast %28 : vector<1x8x1x8x3xbf16> to vector<8x1x8x3xbf16>
    %c1_i32_30 = arith.constant 1 : i32
    %30 = arith.addi %1, %c1_i32_30 : i32
    %c0_31 = arith.constant 0 : index
    %31 = arith.index_cast %30 : i32 to index
    %c0_32 = arith.constant 0 : index
    %c0_33 = arith.constant 0 : index
    %c3_34 = arith.constant 3 : index
    %32 = vector.load %arg2[%c0_31, %31, %c0_32, %c0_33, %c3_34] : memref<1x9x2x9x6xbf16, #tpu.memory_space<vmem>>, vector<1x8x1x8x3xbf16>
    %33 = vector.shape_cast %32 : vector<1x8x1x8x3xbf16> to vector<8x1x8x3xbf16>
    %c1_i32_35 = arith.constant 1 : i32
    %34 = arith.addi %1, %c1_i32_35 : i32
    %c0_36 = arith.constant 0 : index
    %35 = arith.index_cast %34 : i32 to index
    %c0_37 = arith.constant 0 : index
    %c1_38 = arith.constant 1 : index
    %c0_39 = arith.constant 0 : index
    %36 = vector.load %arg2[%c0_36, %35, %c0_37, %c1_38, %c0_39] : memref<1x9x2x9x6xbf16, #tpu.memory_space<vmem>>, vector<1x8x1x8x3xbf16>
    %37 = vector.shape_cast %36 : vector<1x8x1x8x3xbf16> to vector<8x1x8x3xbf16>
    %38 = tpu.concatenate %5, %9, %13, %17, %21, %25, %29, %33, %37 in 3 : vector<8x1x8x3xbf16>, vector<8x1x8x3xbf16>, vector<8x1x8x3xbf16>, vector<8x1x8x3xbf16>, vector<8x1x8x3xbf16>, vector<8x1x8x3xbf16>, vector<8x1x8x3xbf16>, vector<8x1x8x3xbf16>, vector<8x1x8x3xbf16> -> vector<8x1x8x27xbf16>
    %39 = vector.shape_cast %38 : vector<8x1x8x27xbf16> to vector<64x27xbf16>
    %c0_40 = arith.constant 0 : index
    %c0_41 = arith.constant 0 : index
    %40 = vector.load %arg3[%c0_40, %c0_41] : memref<27x16xbf16, #tpu.memory_space<vmem>>, vector<27x16xbf16>
    %cst = arith.constant dense<0.000000e+00> : vector<64x16xf32>
    %41 = tpu.matmul %39, %40, %cst {dimension_numbers = #tpu.dot_dimension_numbers<[1], [0], [0], [1], [0, 0, 1, 1], [], []>} : vector<64x27xbf16>, vector<27x16xbf16>, vector<64x16xf32> -> vector<64x16xf32>
    %c0_42 = arith.constant 0 : index
    %c0_43 = arith.constant 0 : index
    %42 = vector.load %arg4[%c0_42, %c0_43] : memref<1x16xf32, #tpu.memory_space<vmem>>, vector<1x16xf32>
    %43 = vector.broadcast %42 : vector<1x16xf32> to vector<64x16xf32>
    %44 = arith.addf %41, %43 : vector<64x16xf32>
    %cst_44 = arith.constant 0.000000e+00 : f32
    %45 = vector.broadcast %cst_44 : f32 to vector<64x16xf32>
    %46 = arith.maximumf %44, %45 : vector<64x16xf32>
    %47 = vector.shape_cast %46 : vector<64x16xf32> to vector<1x8x8x16xf32>
    %48 = arith.truncf %47 : vector<1x8x8x16xf32> to vector<1x8x8x16xbf16>
    %c0_45 = arith.constant 0 : index
    %c0_46 = arith.constant 0 : index
    %c0_47 = arith.constant 0 : index
    %c0_48 = arith.constant 0 : index
    %49 = vector.load %arg5[%c0_45, %c0_46, %c0_47, %c0_48] : memref<1x8x8x16xbf16, #tpu.memory_space<vmem>>, vector<1x8x8x16xbf16>
    tpu.vector_store %arg5[%c0_45, %c0_46, %c0_47, %c0_48], %48 {strides = array<i32>} : memref<1x8x8x16xbf16, #tpu.memory_space<vmem>>, vector<1x8x8x16xbf16>,
    return
  }
  func.func @transform_0(%arg0: i32, %arg1: i32) -> (i32, i32, i32, i32, i32) {
    %c0_i32 = arith.constant 0 : i32
    %c0_i32_0 = arith.constant 0 : i32
    %c0_i32_1 = arith.constant 0 : i32
    %c0_i32_2 = arith.constant 0 : i32
    %c0_i32_3 = arith.constant 0 : i32
    return %arg0, %c0_i32, %c0_i32_0, %c0_i32_1, %c0_i32_2 : i32, i32, i32, i32, i32
  }
  func.func @transform_1(%arg0: i32, %arg1: i32) -> (i32, i32) {
    %c0_i32 = arith.constant 0 : i32
    %c0_i32_0 = arith.constant 0 : i32
    %c0_i32_1 = arith.constant 0 : i32
    return %c0_i32, %c0_i32_0 : i32, i32
  }
  func.func @transform_2(%arg0: i32, %arg1: i32) -> (i32, i32) {
    %c0_i32 = arith.constant 0 : i32
    %c0_i32_0 = arith.constant 0 : i32
    %c0_i32_1 = arith.constant 0 : i32
    return %c0_i32, %c0_i32_0 : i32, i32
  }
  func.func @transform_3(%arg0: i32, %arg1: i32) -> (i32, i32, i32, i32) {
    %c0_i32 = arith.constant 0 : i32
    %c0_i32_0 = arith.constant 0 : i32
    %c0_i32_1 = arith.constant 0 : i32
    return %arg0, %arg1, %c0_i32, %c0_i32_0 : i32, i32, i32, i32
  }
}

module attributes {stable_mosaic.version = 11 : i64} {
  func.func @_stem2_stage_head_kernel(%arg0: i32, %arg1: i32, %arg2: memref<1x5x2x5x32xbf16, #tpu.memory_space<vmem>>, %arg3: memref<144x18xbf16, #tpu.memory_space<vmem>>, %arg4: memref<1x18xf32, #tpu.memory_space<vmem>>, %arg5: memref<162x18xbf16, #tpu.memory_space<vmem>>, %arg6: memref<1x18xf32, #tpu.memory_space<vmem>>, %arg7: memref<18x8xbf16, #tpu.memory_space<vmem>>, %arg8: memref<1x8xf32, #tpu.memory_space<vmem>>, %arg9: memref<1x8x4x4xf32, #tpu.memory_space<vmem>>, %arg10: memref<6x6x18xbf16, #tpu.memory_space<vmem>>) attributes {dimension_semantics = [#tpu.dimension_semantics<parallel>, #tpu.dimension_semantics<arbitrary>], iteration_bounds = array<i64: 2, 1>, scalar_prefetch = 0 : i64, scratch_operands = 1 : i64, tpu.core_type = #tpu.core_type<tc>, window_params = [{transform_indices = @transform_0, window_bounds = array<i64: 1, 5, 2, 5, 32>}, {pipeline_mode = #tpu.pipeline_mode<synchronous>, transform_indices = @transform_1, window_bounds = array<i64: 144, 18>}, {pipeline_mode = #tpu.pipeline_mode<synchronous>, transform_indices = @transform_2, window_bounds = array<i64: 1, 18>}, {pipeline_mode = #tpu.pipeline_mode<synchronous>, transform_indices = @transform_3, window_bounds = array<i64: 162, 18>}, {pipeline_mode = #tpu.pipeline_mode<synchronous>, transform_indices = @transform_4, window_bounds = array<i64: 1, 18>}, {pipeline_mode = #tpu.pipeline_mode<synchronous>, transform_indices = @transform_5, window_bounds = array<i64: 18, 8>}, {pipeline_mode = #tpu.pipeline_mode<synchronous>, transform_indices = @transform_6, window_bounds = array<i64: 1, 8>}, {transform_indices = @transform_7, window_bounds = array<i64: 1, 8, 4, 4>}]} {
    %c0_i32 = arith.constant 0 : i32
    %0 = arith.cmpi eq, %arg1, %c0_i32 : i32
    %1 = arith.extui %0 : i1 to i32
    %c0_i32_0 = arith.constant 0 : i32
    %2 = arith.cmpi ne, %1, %c0_i32_0 : i32
    scf.if %2 {
      %cst_37 = arith.constant 0.000000e+00 : bf16
      %72 = vector.broadcast %cst_37 : bf16 to vector<6x6x18xbf16>
      %c0_38 = arith.constant 0 : index
      %c0_39 = arith.constant 0 : index
      %c0_40 = arith.constant 0 : index
      %73 = vector.load %arg10[%c0_38, %c0_39, %c0_40] : memref<6x6x18xbf16, #tpu.memory_space<vmem>>, vector<6x6x18xbf16>
      tpu.vector_store %arg10[%c0_38, %c0_39, %c0_40], %72 {strides = array<i32>} : memref<6x6x18xbf16, #tpu.memory_space<vmem>>, vector<6x6x18xbf16>,
      %c0_41 = arith.constant 0 : index
      %c0_42 = arith.constant 0 : index
      %c0_43 = arith.constant 0 : index
      %c0_44 = arith.constant 0 : index
      %c0_45 = arith.constant 0 : index
      %74 = vector.load %arg2[%c0_41, %c0_42, %c0_43, %c0_44, %c0_45] : memref<1x5x2x5x32xbf16, #tpu.memory_space<vmem>>, vector<1x4x1x4x16xbf16>
      %75 = vector.shape_cast %74 : vector<1x4x1x4x16xbf16> to vector<4x1x4x16xbf16>
      %c0_46 = arith.constant 0 : index
      %c0_47 = arith.constant 0 : index
      %c0_48 = arith.constant 0 : index
      %c0_49 = arith.constant 0 : index
      %c16 = arith.constant 16 : index
      %76 = vector.load %arg2[%c0_46, %c0_47, %c0_48, %c0_49, %c16] : memref<1x5x2x5x32xbf16, #tpu.memory_space<vmem>>, vector<1x4x1x4x16xbf16>
      %77 = vector.shape_cast %76 : vector<1x4x1x4x16xbf16> to vector<4x1x4x16xbf16>
      %c0_50 = arith.constant 0 : index
      %c0_51 = arith.constant 0 : index
      %c0_52 = arith.constant 0 : index
      %c1_53 = arith.constant 1 : index
      %c0_54 = arith.constant 0 : index
      %78 = vector.load %arg2[%c0_50, %c0_51, %c0_52, %c1_53, %c0_54] : memref<1x5x2x5x32xbf16, #tpu.memory_space<vmem>>, vector<1x4x1x4x16xbf16>
      %79 = vector.shape_cast %78 : vector<1x4x1x4x16xbf16> to vector<4x1x4x16xbf16>
      %c0_55 = arith.constant 0 : index
      %c0_56 = arith.constant 0 : index
      %c1_57 = arith.constant 1 : index
      %c0_58 = arith.constant 0 : index
      %c0_59 = arith.constant 0 : index
      %80 = vector.load %arg2[%c0_55, %c0_56, %c1_57, %c0_58, %c0_59] : memref<1x5x2x5x32xbf16, #tpu.memory_space<vmem>>, vector<1x4x1x4x16xbf16>
      %81 = vector.shape_cast %80 : vector<1x4x1x4x16xbf16> to vector<4x1x4x16xbf16>
      %c0_60 = arith.constant 0 : index
      %c0_61 = arith.constant 0 : index
      %c1_62 = arith.constant 1 : index
      %c0_63 = arith.constant 0 : index
      %c16_64 = arith.constant 16 : index
      %82 = vector.load %arg2[%c0_60, %c0_61, %c1_62, %c0_63, %c16_64] : memref<1x5x2x5x32xbf16, #tpu.memory_space<vmem>>, vector<1x4x1x4x16xbf16>
      %83 = vector.shape_cast %82 : vector<1x4x1x4x16xbf16> to vector<4x1x4x16xbf16>
      %c0_65 = arith.constant 0 : index
      %c0_66 = arith.constant 0 : index
      %c1_67 = arith.constant 1 : index
      %c1_68 = arith.constant 1 : index
      %c0_69 = arith.constant 0 : index
      %84 = vector.load %arg2[%c0_65, %c0_66, %c1_67, %c1_68, %c0_69] : memref<1x5x2x5x32xbf16, #tpu.memory_space<vmem>>, vector<1x4x1x4x16xbf16>
      %85 = vector.shape_cast %84 : vector<1x4x1x4x16xbf16> to vector<4x1x4x16xbf16>
      %c0_70 = arith.constant 0 : index
      %c1_71 = arith.constant 1 : index
      %c0_72 = arith.constant 0 : index
      %c0_73 = arith.constant 0 : index
      %c0_74 = arith.constant 0 : index
      %86 = vector.load %arg2[%c0_70, %c1_71, %c0_72, %c0_73, %c0_74] : memref<1x5x2x5x32xbf16, #tpu.memory_space<vmem>>, vector<1x4x1x4x16xbf16>
      %87 = vector.shape_cast %86 : vector<1x4x1x4x16xbf16> to vector<4x1x4x16xbf16>
      %c0_75 = arith.constant 0 : index
      %c1_76 = arith.constant 1 : index
      %c0_77 = arith.constant 0 : index
      %c0_78 = arith.constant 0 : index
      %c16_79 = arith.constant 16 : index
      %88 = vector.load %arg2[%c0_75, %c1_76, %c0_77, %c0_78, %c16_79] : memref<1x5x2x5x32xbf16, #tpu.memory_space<vmem>>, vector<1x4x1x4x16xbf16>
      %89 = vector.shape_cast %88 : vector<1x4x1x4x16xbf16> to vector<4x1x4x16xbf16>
      %c0_80 = arith.constant 0 : index
      %c1_81 = arith.constant 1 : index
      %c0_82 = arith.constant 0 : index
      %c1_83 = arith.constant 1 : index
      %c0_84 = arith.constant 0 : index
      %90 = vector.load %arg2[%c0_80, %c1_81, %c0_82, %c1_83, %c0_84] : memref<1x5x2x5x32xbf16, #tpu.memory_space<vmem>>, vector<1x4x1x4x16xbf16>
      %91 = vector.shape_cast %90 : vector<1x4x1x4x16xbf16> to vector<4x1x4x16xbf16>
      %92 = tpu.concatenate %75, %77, %79, %81, %83, %85, %87, %89, %91 in 3 : vector<4x1x4x16xbf16>, vector<4x1x4x16xbf16>, vector<4x1x4x16xbf16>, vector<4x1x4x16xbf16>, vector<4x1x4x16xbf16>, vector<4x1x4x16xbf16>, vector<4x1x4x16xbf16>, vector<4x1x4x16xbf16>, vector<4x1x4x16xbf16> -> vector<4x1x4x144xbf16>
      %93 = vector.shape_cast %92 : vector<4x1x4x144xbf16> to vector<16x144xbf16>
      %c0_85 = arith.constant 0 : index
      %c0_86 = arith.constant 0 : index
      %94 = vector.load %arg3[%c0_85, %c0_86] : memref<144x18xbf16, #tpu.memory_space<vmem>>, vector<144x18xbf16>
      %cst_87 = arith.constant dense<0.000000e+00> : vector<16x18xf32>
      %95 = tpu.matmul %93, %94, %cst_87 {dimension_numbers = #tpu.dot_dimension_numbers<[1], [0], [0], [1], [0, 0, 1, 1], [], []>} : vector<16x144xbf16>, vector<144x18xbf16>, vector<16x18xf32> -> vector<16x18xf32>
      %c0_88 = arith.constant 0 : index
      %c0_89 = arith.constant 0 : index
      %96 = vector.load %arg4[%c0_88, %c0_89] : memref<1x18xf32, #tpu.memory_space<vmem>>, vector<1x18xf32>
      %97 = vector.broadcast %96 : vector<1x18xf32> to vector<16x18xf32>
      %98 = arith.addf %95, %97 : vector<16x18xf32>
      %cst_90 = arith.constant 0.000000e+00 : f32
      %99 = vector.broadcast %cst_90 : f32 to vector<16x18xf32>
      %100 = arith.maximumf %98, %99 : vector<16x18xf32>
      %101 = arith.truncf %100 : vector<16x18xf32> to vector<16x18xbf16>
      %102 = vector.shape_cast %101 : vector<16x18xbf16> to vector<4x4x18xbf16>
      %c1_91 = arith.constant 1 : index
      %c1_92 = arith.constant 1 : index
      %c0_93 = arith.constant 0 : index
      %103 = vector.load %arg10[%c1_91, %c1_92, %c0_93] : memref<6x6x18xbf16, #tpu.memory_space<vmem>>, vector<4x4x18xbf16>
      tpu.vector_store %arg10[%c1_91, %c1_92, %c0_93], %102 {strides = array<i32>} : memref<6x6x18xbf16, #tpu.memory_space<vmem>>, vector<4x4x18xbf16>,
    } else {
    }
    %c4_i32 = arith.constant 4 : i32
    %3 = arith.muli %arg1, %c4_i32 : i32
    %4 = tpu.assume_multiple %3, 4 : i32
    %5 = arith.index_cast %4 : i32 to index
    %c0 = arith.constant 0 : index
    %c0_1 = arith.constant 0 : index
    %6 = vector.load %arg10[%5, %c0, %c0_1] : memref<6x6x18xbf16, #tpu.memory_space<vmem>>, vector<6x6x18xbf16>
    %7 = vector.extract_strided_slice %6 {offsets = [0, 0, 0], sizes = [4, 4, 18], strides = [1, 1, 1]} : vector<6x6x18xbf16> to vector<4x4x18xbf16>
    %8 = vector.extract_strided_slice %6 {offsets = [0, 1, 0], sizes = [4, 4, 18], strides = [1, 1, 1]} : vector<6x6x18xbf16> to vector<4x4x18xbf16>
    %9 = vector.extract_strided_slice %6 {offsets = [0, 2, 0], sizes = [4, 4, 18], strides = [1, 1, 1]} : vector<6x6x18xbf16> to vector<4x4x18xbf16>
    %10 = vector.extract_strided_slice %6 {offsets = [1, 0, 0], sizes = [4, 4, 18], strides = [1, 1, 1]} : vector<6x6x18xbf16> to vector<4x4x18xbf16>
    %11 = vector.extract_strided_slice %6 {offsets = [1, 1, 0], sizes = [4, 4, 18], strides = [1, 1, 1]} : vector<6x6x18xbf16> to vector<4x4x18xbf16>
    %12 = vector.extract_strided_slice %6 {offsets = [1, 2, 0], sizes = [4, 4, 18], strides = [1, 1, 1]} : vector<6x6x18xbf16> to vector<4x4x18xbf16>
    %13 = vector.extract_strided_slice %6 {offsets = [2, 0, 0], sizes = [4, 4, 18], strides = [1, 1, 1]} : vector<6x6x18xbf16> to vector<4x4x18xbf16>
    %14 = vector.extract_strided_slice %6 {offsets = [2, 1, 0], sizes = [4, 4, 18], strides = [1, 1, 1]} : vector<6x6x18xbf16> to vector<4x4x18xbf16>
    %15 = vector.extract_strided_slice %6 {offsets = [2, 2, 0], sizes = [4, 4, 18], strides = [1, 1, 1]} : vector<6x6x18xbf16> to vector<4x4x18xbf16>
    %16 = tpu.concatenate %7, %8, %9, %10, %11, %12, %13, %14, %15 in 2 : vector<4x4x18xbf16>, vector<4x4x18xbf16>, vector<4x4x18xbf16>, vector<4x4x18xbf16>, vector<4x4x18xbf16>, vector<4x4x18xbf16>, vector<4x4x18xbf16>, vector<4x4x18xbf16>, vector<4x4x18xbf16> -> vector<4x4x162xbf16>
    %17 = vector.shape_cast %16 : vector<4x4x162xbf16> to vector<16x162xbf16>
    %c0_2 = arith.constant 0 : index
    %c0_3 = arith.constant 0 : index
    %18 = vector.load %arg5[%c0_2, %c0_3] : memref<162x18xbf16, #tpu.memory_space<vmem>>, vector<162x18xbf16>
    %cst = arith.constant dense<0.000000e+00> : vector<16x18xf32>
    %19 = tpu.matmul %17, %18, %cst {dimension_numbers = #tpu.dot_dimension_numbers<[1], [0], [0], [1], [0, 0, 1, 1], [], []>} : vector<16x162xbf16>, vector<162x18xbf16>, vector<16x18xf32> -> vector<16x18xf32>
    %c0_4 = arith.constant 0 : index
    %c0_5 = arith.constant 0 : index
    %20 = vector.load %arg6[%c0_4, %c0_5] : memref<1x18xf32, #tpu.memory_space<vmem>>, vector<1x18xf32>
    %21 = vector.broadcast %20 : vector<1x18xf32> to vector<16x18xf32>
    %22 = arith.addf %19, %21 : vector<16x18xf32>
    %cst_6 = arith.constant 0.000000e+00 : f32
    %23 = vector.broadcast %cst_6 : f32 to vector<16x18xf32>
    %24 = arith.maximumf %22, %23 : vector<16x18xf32>
    %25 = arith.truncf %24 : vector<16x18xf32> to vector<16x18xbf16>
    %c0_7 = arith.constant 0 : index
    %c0_8 = arith.constant 0 : index
    %26 = vector.load %arg7[%c0_7, %c0_8] : memref<18x8xbf16, #tpu.memory_space<vmem>>, vector<18x8xbf16>
    %cst_9 = arith.constant dense<0.000000e+00> : vector<16x8xf32>
    %27 = tpu.matmul %25, %26, %cst_9 {dimension_numbers = #tpu.dot_dimension_numbers<[1], [0], [0], [1], [0, 0, 1, 1], [], []>} : vector<16x18xbf16>, vector<18x8xbf16>, vector<16x8xf32> -> vector<16x8xf32>
    %c0_10 = arith.constant 0 : index
    %c0_11 = arith.constant 0 : index
    %28 = vector.load %arg8[%c0_10, %c0_11] : memref<1x8xf32, #tpu.memory_space<vmem>>, vector<1x8xf32>
    %29 = vector.broadcast %28 : vector<1x8xf32> to vector<16x8xf32>
    %30 = arith.addf %27, %29 : vector<16x8xf32>
    %31 = vector.shape_cast %30 : vector<16x8xf32> to vector<4x4x8xf32>
    %32 = vector.extract_strided_slice %31 {offsets = [0, 0, 0], sizes = [4, 4, 1], strides = [1, 1, 1]} : vector<4x4x8xf32> to vector<4x4x1xf32>
    %33 = vector.shape_cast %32 : vector<4x4x1xf32> to vector<4x4xf32>
    %c0_12 = arith.constant 0 : index
    %c0_13 = arith.constant 0 : index
    %c0_14 = arith.constant 0 : index
    %c0_15 = arith.constant 0 : index
    %34 = vector.load %arg9[%c0_12, %c0_13, %c0_14, %c0_15] : memref<1x8x4x4xf32, #tpu.memory_space<vmem>>, vector<1x1x4x4xf32>
    %35 = vector.shape_cast %34 : vector<1x1x4x4xf32> to vector<4x4xf32>
    %36 = vector.shape_cast %33 : vector<4x4xf32> to vector<1x1x4x4xf32>
    tpu.vector_store %arg9[%c0_12, %c0_13, %c0_14, %c0_15], %36 {strides = array<i32>} : memref<1x8x4x4xf32, #tpu.memory_space<vmem>>, vector<1x1x4x4xf32>,
    %37 = vector.extract_strided_slice %31 {offsets = [0, 0, 1], sizes = [4, 4, 1], strides = [1, 1, 1]} : vector<4x4x8xf32> to vector<4x4x1xf32>
    %38 = vector.shape_cast %37 : vector<4x4x1xf32> to vector<4x4xf32>
    %c0_16 = arith.constant 0 : index
    %c1 = arith.constant 1 : index
    %c0_17 = arith.constant 0 : index
    %c0_18 = arith.constant 0 : index
    %39 = vector.load %arg9[%c0_16, %c1, %c0_17, %c0_18] : memref<1x8x4x4xf32, #tpu.memory_space<vmem>>, vector<1x1x4x4xf32>
    %40 = vector.shape_cast %39 : vector<1x1x4x4xf32> to vector<4x4xf32>
    %41 = vector.shape_cast %38 : vector<4x4xf32> to vector<1x1x4x4xf32>
    tpu.vector_store %arg9[%c0_16, %c1, %c0_17, %c0_18], %41 {strides = array<i32>} : memref<1x8x4x4xf32, #tpu.memory_space<vmem>>, vector<1x1x4x4xf32>,
    %42 = vector.extract_strided_slice %31 {offsets = [0, 0, 2], sizes = [4, 4, 1], strides = [1, 1, 1]} : vector<4x4x8xf32> to vector<4x4x1xf32>
    %43 = vector.shape_cast %42 : vector<4x4x1xf32> to vector<4x4xf32>
    %c0_19 = arith.constant 0 : index
    %c2 = arith.constant 2 : index
    %c0_20 = arith.constant 0 : index
    %c0_21 = arith.constant 0 : index
    %44 = vector.load %arg9[%c0_19, %c2, %c0_20, %c0_21] : memref<1x8x4x4xf32, #tpu.memory_space<vmem>>, vector<1x1x4x4xf32>
    %45 = vector.shape_cast %44 : vector<1x1x4x4xf32> to vector<4x4xf32>
    %46 = vector.shape_cast %43 : vector<4x4xf32> to vector<1x1x4x4xf32>
    tpu.vector_store %arg9[%c0_19, %c2, %c0_20, %c0_21], %46 {strides = array<i32>} : memref<1x8x4x4xf32, #tpu.memory_space<vmem>>, vector<1x1x4x4xf32>,
    %47 = vector.extract_strided_slice %31 {offsets = [0, 0, 3], sizes = [4, 4, 1], strides = [1, 1, 1]} : vector<4x4x8xf32> to vector<4x4x1xf32>
    %48 = vector.shape_cast %47 : vector<4x4x1xf32> to vector<4x4xf32>
    %c0_22 = arith.constant 0 : index
    %c3 = arith.constant 3 : index
    %c0_23 = arith.constant 0 : index
    %c0_24 = arith.constant 0 : index
    %49 = vector.load %arg9[%c0_22, %c3, %c0_23, %c0_24] : memref<1x8x4x4xf32, #tpu.memory_space<vmem>>, vector<1x1x4x4xf32>
    %50 = vector.shape_cast %49 : vector<1x1x4x4xf32> to vector<4x4xf32>
    %51 = vector.shape_cast %48 : vector<4x4xf32> to vector<1x1x4x4xf32>
    tpu.vector_store %arg9[%c0_22, %c3, %c0_23, %c0_24], %51 {strides = array<i32>} : memref<1x8x4x4xf32, #tpu.memory_space<vmem>>, vector<1x1x4x4xf32>,
    %52 = vector.extract_strided_slice %31 {offsets = [0, 0, 4], sizes = [4, 4, 1], strides = [1, 1, 1]} : vector<4x4x8xf32> to vector<4x4x1xf32>
    %53 = vector.shape_cast %52 : vector<4x4x1xf32> to vector<4x4xf32>
    %c0_25 = arith.constant 0 : index
    %c4 = arith.constant 4 : index
    %c0_26 = arith.constant 0 : index
    %c0_27 = arith.constant 0 : index
    %54 = vector.load %arg9[%c0_25, %c4, %c0_26, %c0_27] : memref<1x8x4x4xf32, #tpu.memory_space<vmem>>, vector<1x1x4x4xf32>
    %55 = vector.shape_cast %54 : vector<1x1x4x4xf32> to vector<4x4xf32>
    %56 = vector.shape_cast %53 : vector<4x4xf32> to vector<1x1x4x4xf32>
    tpu.vector_store %arg9[%c0_25, %c4, %c0_26, %c0_27], %56 {strides = array<i32>} : memref<1x8x4x4xf32, #tpu.memory_space<vmem>>, vector<1x1x4x4xf32>,
    %57 = vector.extract_strided_slice %31 {offsets = [0, 0, 5], sizes = [4, 4, 1], strides = [1, 1, 1]} : vector<4x4x8xf32> to vector<4x4x1xf32>
    %58 = vector.shape_cast %57 : vector<4x4x1xf32> to vector<4x4xf32>
    %c0_28 = arith.constant 0 : index
    %c5 = arith.constant 5 : index
    %c0_29 = arith.constant 0 : index
    %c0_30 = arith.constant 0 : index
    %59 = vector.load %arg9[%c0_28, %c5, %c0_29, %c0_30] : memref<1x8x4x4xf32, #tpu.memory_space<vmem>>, vector<1x1x4x4xf32>
    %60 = vector.shape_cast %59 : vector<1x1x4x4xf32> to vector<4x4xf32>
    %61 = vector.shape_cast %58 : vector<4x4xf32> to vector<1x1x4x4xf32>
    tpu.vector_store %arg9[%c0_28, %c5, %c0_29, %c0_30], %61 {strides = array<i32>} : memref<1x8x4x4xf32, #tpu.memory_space<vmem>>, vector<1x1x4x4xf32>,
    %62 = vector.extract_strided_slice %31 {offsets = [0, 0, 6], sizes = [4, 4, 1], strides = [1, 1, 1]} : vector<4x4x8xf32> to vector<4x4x1xf32>
    %63 = vector.shape_cast %62 : vector<4x4x1xf32> to vector<4x4xf32>
    %c0_31 = arith.constant 0 : index
    %c6 = arith.constant 6 : index
    %c0_32 = arith.constant 0 : index
    %c0_33 = arith.constant 0 : index
    %64 = vector.load %arg9[%c0_31, %c6, %c0_32, %c0_33] : memref<1x8x4x4xf32, #tpu.memory_space<vmem>>, vector<1x1x4x4xf32>
    %65 = vector.shape_cast %64 : vector<1x1x4x4xf32> to vector<4x4xf32>
    %66 = vector.shape_cast %63 : vector<4x4xf32> to vector<1x1x4x4xf32>
    tpu.vector_store %arg9[%c0_31, %c6, %c0_32, %c0_33], %66 {strides = array<i32>} : memref<1x8x4x4xf32, #tpu.memory_space<vmem>>, vector<1x1x4x4xf32>,
    %67 = vector.extract_strided_slice %31 {offsets = [0, 0, 7], sizes = [4, 4, 1], strides = [1, 1, 1]} : vector<4x4x8xf32> to vector<4x4x1xf32>
    %68 = vector.shape_cast %67 : vector<4x4x1xf32> to vector<4x4xf32>
    %c0_34 = arith.constant 0 : index
    %c7 = arith.constant 7 : index
    %c0_35 = arith.constant 0 : index
    %c0_36 = arith.constant 0 : index
    %69 = vector.load %arg9[%c0_34, %c7, %c0_35, %c0_36] : memref<1x8x4x4xf32, #tpu.memory_space<vmem>>, vector<1x1x4x4xf32>
    %70 = vector.shape_cast %69 : vector<1x1x4x4xf32> to vector<4x4xf32>
    %71 = vector.shape_cast %68 : vector<4x4xf32> to vector<1x1x4x4xf32>
    tpu.vector_store %arg9[%c0_34, %c7, %c0_35, %c0_36], %71 {strides = array<i32>} : memref<1x8x4x4xf32, #tpu.memory_space<vmem>>, vector<1x1x4x4xf32>,
    return
  }
  func.func @transform_0(%arg0: i32, %arg1: i32) -> (i32, i32, i32, i32, i32) {
    %c0_i32 = arith.constant 0 : i32
    %c0_i32_0 = arith.constant 0 : i32
    %c0_i32_1 = arith.constant 0 : i32
    %c0_i32_2 = arith.constant 0 : i32
    %c0_i32_3 = arith.constant 0 : i32
    return %arg0, %c0_i32, %c0_i32_0, %c0_i32_1, %c0_i32_2 : i32, i32, i32, i32, i32
  }
  func.func @transform_1(%arg0: i32, %arg1: i32) -> (i32, i32) {
    %c0_i32 = arith.constant 0 : i32
    %c0_i32_0 = arith.constant 0 : i32
    %c0_i32_1 = arith.constant 0 : i32
    return %c0_i32, %c0_i32_0 : i32, i32
  }
  func.func @transform_2(%arg0: i32, %arg1: i32) -> (i32, i32) {
    %c0_i32 = arith.constant 0 : i32
    %c0_i32_0 = arith.constant 0 : i32
    %c0_i32_1 = arith.constant 0 : i32
    return %c0_i32, %c0_i32_0 : i32, i32
  }
  func.func @transform_3(%arg0: i32, %arg1: i32) -> (i32, i32) {
    %c0_i32 = arith.constant 0 : i32
    %c0_i32_0 = arith.constant 0 : i32
    %c0_i32_1 = arith.constant 0 : i32
    return %c0_i32, %c0_i32_0 : i32, i32
  }
  func.func @transform_4(%arg0: i32, %arg1: i32) -> (i32, i32) {
    %c0_i32 = arith.constant 0 : i32
    %c0_i32_0 = arith.constant 0 : i32
    %c0_i32_1 = arith.constant 0 : i32
    return %c0_i32, %c0_i32_0 : i32, i32
  }
  func.func @transform_5(%arg0: i32, %arg1: i32) -> (i32, i32) {
    %c0_i32 = arith.constant 0 : i32
    %c0_i32_0 = arith.constant 0 : i32
    %c0_i32_1 = arith.constant 0 : i32
    return %c0_i32, %c0_i32_0 : i32, i32
  }
  func.func @transform_6(%arg0: i32, %arg1: i32) -> (i32, i32) {
    %c0_i32 = arith.constant 0 : i32
    %c0_i32_0 = arith.constant 0 : i32
    %c0_i32_1 = arith.constant 0 : i32
    return %c0_i32, %c0_i32_0 : i32, i32
  }
  func.func @transform_7(%arg0: i32, %arg1: i32) -> (i32, i32, i32, i32) {
    %c0_i32 = arith.constant 0 : i32
    %c0_i32_0 = arith.constant 0 : i32
    %c0_i32_1 = arith.constant 0 : i32
    return %arg0, %c0_i32, %arg1, %c0_i32_0 : i32, i32, i32, i32
  }
}

module attributes {stable_mosaic.version = 11 : i64} {
  func.func @_bilinear_kernel(%arg0: i32, %arg1: i32, %arg2: memref<1x8x4x4xf32, #tpu.memory_space<vmem>>, %arg3: memref<16x4xf32, #tpu.memory_space<vmem>>, %arg4: memref<4x16xf32, #tpu.memory_space<vmem>>, %arg5: memref<1x8x16x16xf32, #tpu.memory_space<vmem>>) attributes {dimension_semantics = [#tpu.dimension_semantics<parallel>, #tpu.dimension_semantics<parallel>], iteration_bounds = array<i64: 2, 1>, scalar_prefetch = 0 : i64, scratch_operands = 0 : i64, tpu.core_type = #tpu.core_type<tc>, window_params = [{transform_indices = @transform_0, window_bounds = array<i64: 1, 8, 4, 4>}, {transform_indices = @transform_1, window_bounds = array<i64: 16, 4>}, {pipeline_mode = #tpu.pipeline_mode<synchronous>, transform_indices = @transform_2, window_bounds = array<i64: 4, 16>}, {transform_indices = @transform_3, window_bounds = array<i64: 1, 8, 16, 16>}]} {
    %c0 = arith.constant 0 : index
    %c0_0 = arith.constant 0 : index
    %c0_1 = arith.constant 0 : index
    %c0_2 = arith.constant 0 : index
    %0 = vector.load %arg2[%c0, %c0_0, %c0_1, %c0_2] : memref<1x8x4x4xf32, #tpu.memory_space<vmem>>, vector<1x8x4x4xf32>
    %1 = vector.shape_cast %0 : vector<1x8x4x4xf32> to vector<8x4x4xf32>
    %2 = vector.shape_cast %1 : vector<8x4x4xf32> to vector<32x4xf32>
    %c0_3 = arith.constant 0 : index
    %c0_4 = arith.constant 0 : index
    %3 = vector.load %arg4[%c0_3, %c0_4] : memref<4x16xf32, #tpu.memory_space<vmem>>, vector<4x16xf32>
    %cst = arith.constant dense<0.000000e+00> : vector<32x16xf32>
    %4 = tpu.matmul %2, %3, %cst {dimension_numbers = #tpu.dot_dimension_numbers<[1], [0], [0], [1], [0, 0, 1, 1], [], []>} : vector<32x4xf32>, vector<4x16xf32>, vector<32x16xf32> -> vector<32x16xf32>
    %5 = vector.shape_cast %4 : vector<32x16xf32> to vector<8x4x16xf32>
    %c0_5 = arith.constant 0 : index
    %c0_6 = arith.constant 0 : index
    %6 = vector.load %arg3[%c0_5, %c0_6] : memref<16x4xf32, #tpu.memory_space<vmem>>, vector<16x4xf32>
    %7 = vector.extract_strided_slice %5 {offsets = [0, 0, 0], sizes = [1, 4, 16], strides = [1, 1, 1]} : vector<8x4x16xf32> to vector<1x4x16xf32>
    %8 = vector.shape_cast %7 : vector<1x4x16xf32> to vector<4x16xf32>
    %cst_7 = arith.constant dense<0.000000e+00> : vector<16x16xf32>
    %9 = tpu.matmul %6, %8, %cst_7 {dimension_numbers = #tpu.dot_dimension_numbers<[1], [0], [0], [1], [0, 0, 1, 1], [], []>} : vector<16x4xf32>, vector<4x16xf32>, vector<16x16xf32> -> vector<16x16xf32>
    %c0_8 = arith.constant 0 : index
    %c0_9 = arith.constant 0 : index
    %c0_10 = arith.constant 0 : index
    %c0_11 = arith.constant 0 : index
    %10 = vector.load %arg5[%c0_8, %c0_9, %c0_10, %c0_11] : memref<1x8x16x16xf32, #tpu.memory_space<vmem>>, vector<1x1x16x16xf32>
    %11 = vector.shape_cast %10 : vector<1x1x16x16xf32> to vector<16x16xf32>
    %12 = vector.shape_cast %9 : vector<16x16xf32> to vector<1x1x16x16xf32>
    tpu.vector_store %arg5[%c0_8, %c0_9, %c0_10, %c0_11], %12 {strides = array<i32>} : memref<1x8x16x16xf32, #tpu.memory_space<vmem>>, vector<1x1x16x16xf32>,
    %13 = vector.extract_strided_slice %5 {offsets = [1, 0, 0], sizes = [1, 4, 16], strides = [1, 1, 1]} : vector<8x4x16xf32> to vector<1x4x16xf32>
    %14 = vector.shape_cast %13 : vector<1x4x16xf32> to vector<4x16xf32>
    %cst_12 = arith.constant dense<0.000000e+00> : vector<16x16xf32>
    %15 = tpu.matmul %6, %14, %cst_12 {dimension_numbers = #tpu.dot_dimension_numbers<[1], [0], [0], [1], [0, 0, 1, 1], [], []>} : vector<16x4xf32>, vector<4x16xf32>, vector<16x16xf32> -> vector<16x16xf32>
    %c0_13 = arith.constant 0 : index
    %c1 = arith.constant 1 : index
    %c0_14 = arith.constant 0 : index
    %c0_15 = arith.constant 0 : index
    %16 = vector.load %arg5[%c0_13, %c1, %c0_14, %c0_15] : memref<1x8x16x16xf32, #tpu.memory_space<vmem>>, vector<1x1x16x16xf32>
    %17 = vector.shape_cast %16 : vector<1x1x16x16xf32> to vector<16x16xf32>
    %18 = vector.shape_cast %15 : vector<16x16xf32> to vector<1x1x16x16xf32>
    tpu.vector_store %arg5[%c0_13, %c1, %c0_14, %c0_15], %18 {strides = array<i32>} : memref<1x8x16x16xf32, #tpu.memory_space<vmem>>, vector<1x1x16x16xf32>,
    %19 = vector.extract_strided_slice %5 {offsets = [2, 0, 0], sizes = [1, 4, 16], strides = [1, 1, 1]} : vector<8x4x16xf32> to vector<1x4x16xf32>
    %20 = vector.shape_cast %19 : vector<1x4x16xf32> to vector<4x16xf32>
    %cst_16 = arith.constant dense<0.000000e+00> : vector<16x16xf32>
    %21 = tpu.matmul %6, %20, %cst_16 {dimension_numbers = #tpu.dot_dimension_numbers<[1], [0], [0], [1], [0, 0, 1, 1], [], []>} : vector<16x4xf32>, vector<4x16xf32>, vector<16x16xf32> -> vector<16x16xf32>
    %c0_17 = arith.constant 0 : index
    %c2 = arith.constant 2 : index
    %c0_18 = arith.constant 0 : index
    %c0_19 = arith.constant 0 : index
    %22 = vector.load %arg5[%c0_17, %c2, %c0_18, %c0_19] : memref<1x8x16x16xf32, #tpu.memory_space<vmem>>, vector<1x1x16x16xf32>
    %23 = vector.shape_cast %22 : vector<1x1x16x16xf32> to vector<16x16xf32>
    %24 = vector.shape_cast %21 : vector<16x16xf32> to vector<1x1x16x16xf32>
    tpu.vector_store %arg5[%c0_17, %c2, %c0_18, %c0_19], %24 {strides = array<i32>} : memref<1x8x16x16xf32, #tpu.memory_space<vmem>>, vector<1x1x16x16xf32>,
    %25 = vector.extract_strided_slice %5 {offsets = [3, 0, 0], sizes = [1, 4, 16], strides = [1, 1, 1]} : vector<8x4x16xf32> to vector<1x4x16xf32>
    %26 = vector.shape_cast %25 : vector<1x4x16xf32> to vector<4x16xf32>
    %cst_20 = arith.constant dense<0.000000e+00> : vector<16x16xf32>
    %27 = tpu.matmul %6, %26, %cst_20 {dimension_numbers = #tpu.dot_dimension_numbers<[1], [0], [0], [1], [0, 0, 1, 1], [], []>} : vector<16x4xf32>, vector<4x16xf32>, vector<16x16xf32> -> vector<16x16xf32>
    %c0_21 = arith.constant 0 : index
    %c3 = arith.constant 3 : index
    %c0_22 = arith.constant 0 : index
    %c0_23 = arith.constant 0 : index
    %28 = vector.load %arg5[%c0_21, %c3, %c0_22, %c0_23] : memref<1x8x16x16xf32, #tpu.memory_space<vmem>>, vector<1x1x16x16xf32>
    %29 = vector.shape_cast %28 : vector<1x1x16x16xf32> to vector<16x16xf32>
    %30 = vector.shape_cast %27 : vector<16x16xf32> to vector<1x1x16x16xf32>
    tpu.vector_store %arg5[%c0_21, %c3, %c0_22, %c0_23], %30 {strides = array<i32>} : memref<1x8x16x16xf32, #tpu.memory_space<vmem>>, vector<1x1x16x16xf32>,
    %31 = vector.extract_strided_slice %5 {offsets = [4, 0, 0], sizes = [1, 4, 16], strides = [1, 1, 1]} : vector<8x4x16xf32> to vector<1x4x16xf32>
    %32 = vector.shape_cast %31 : vector<1x4x16xf32> to vector<4x16xf32>
    %cst_24 = arith.constant dense<0.000000e+00> : vector<16x16xf32>
    %33 = tpu.matmul %6, %32, %cst_24 {dimension_numbers = #tpu.dot_dimension_numbers<[1], [0], [0], [1], [0, 0, 1, 1], [], []>} : vector<16x4xf32>, vector<4x16xf32>, vector<16x16xf32> -> vector<16x16xf32>
    %c0_25 = arith.constant 0 : index
    %c4 = arith.constant 4 : index
    %c0_26 = arith.constant 0 : index
    %c0_27 = arith.constant 0 : index
    %34 = vector.load %arg5[%c0_25, %c4, %c0_26, %c0_27] : memref<1x8x16x16xf32, #tpu.memory_space<vmem>>, vector<1x1x16x16xf32>
    %35 = vector.shape_cast %34 : vector<1x1x16x16xf32> to vector<16x16xf32>
    %36 = vector.shape_cast %33 : vector<16x16xf32> to vector<1x1x16x16xf32>
    tpu.vector_store %arg5[%c0_25, %c4, %c0_26, %c0_27], %36 {strides = array<i32>} : memref<1x8x16x16xf32, #tpu.memory_space<vmem>>, vector<1x1x16x16xf32>,
    %37 = vector.extract_strided_slice %5 {offsets = [5, 0, 0], sizes = [1, 4, 16], strides = [1, 1, 1]} : vector<8x4x16xf32> to vector<1x4x16xf32>
    %38 = vector.shape_cast %37 : vector<1x4x16xf32> to vector<4x16xf32>
    %cst_28 = arith.constant dense<0.000000e+00> : vector<16x16xf32>
    %39 = tpu.matmul %6, %38, %cst_28 {dimension_numbers = #tpu.dot_dimension_numbers<[1], [0], [0], [1], [0, 0, 1, 1], [], []>} : vector<16x4xf32>, vector<4x16xf32>, vector<16x16xf32> -> vector<16x16xf32>
    %c0_29 = arith.constant 0 : index
    %c5 = arith.constant 5 : index
    %c0_30 = arith.constant 0 : index
    %c0_31 = arith.constant 0 : index
    %40 = vector.load %arg5[%c0_29, %c5, %c0_30, %c0_31] : memref<1x8x16x16xf32, #tpu.memory_space<vmem>>, vector<1x1x16x16xf32>
    %41 = vector.shape_cast %40 : vector<1x1x16x16xf32> to vector<16x16xf32>
    %42 = vector.shape_cast %39 : vector<16x16xf32> to vector<1x1x16x16xf32>
    tpu.vector_store %arg5[%c0_29, %c5, %c0_30, %c0_31], %42 {strides = array<i32>} : memref<1x8x16x16xf32, #tpu.memory_space<vmem>>, vector<1x1x16x16xf32>,
    %43 = vector.extract_strided_slice %5 {offsets = [6, 0, 0], sizes = [1, 4, 16], strides = [1, 1, 1]} : vector<8x4x16xf32> to vector<1x4x16xf32>
    %44 = vector.shape_cast %43 : vector<1x4x16xf32> to vector<4x16xf32>
    %cst_32 = arith.constant dense<0.000000e+00> : vector<16x16xf32>
    %45 = tpu.matmul %6, %44, %cst_32 {dimension_numbers = #tpu.dot_dimension_numbers<[1], [0], [0], [1], [0, 0, 1, 1], [], []>} : vector<16x4xf32>, vector<4x16xf32>, vector<16x16xf32> -> vector<16x16xf32>
    %c0_33 = arith.constant 0 : index
    %c6 = arith.constant 6 : index
    %c0_34 = arith.constant 0 : index
    %c0_35 = arith.constant 0 : index
    %46 = vector.load %arg5[%c0_33, %c6, %c0_34, %c0_35] : memref<1x8x16x16xf32, #tpu.memory_space<vmem>>, vector<1x1x16x16xf32>
    %47 = vector.shape_cast %46 : vector<1x1x16x16xf32> to vector<16x16xf32>
    %48 = vector.shape_cast %45 : vector<16x16xf32> to vector<1x1x16x16xf32>
    tpu.vector_store %arg5[%c0_33, %c6, %c0_34, %c0_35], %48 {strides = array<i32>} : memref<1x8x16x16xf32, #tpu.memory_space<vmem>>, vector<1x1x16x16xf32>,
    %49 = vector.extract_strided_slice %5 {offsets = [7, 0, 0], sizes = [1, 4, 16], strides = [1, 1, 1]} : vector<8x4x16xf32> to vector<1x4x16xf32>
    %50 = vector.shape_cast %49 : vector<1x4x16xf32> to vector<4x16xf32>
    %cst_36 = arith.constant dense<0.000000e+00> : vector<16x16xf32>
    %51 = tpu.matmul %6, %50, %cst_36 {dimension_numbers = #tpu.dot_dimension_numbers<[1], [0], [0], [1], [0, 0, 1, 1], [], []>} : vector<16x4xf32>, vector<4x16xf32>, vector<16x16xf32> -> vector<16x16xf32>
    %c0_37 = arith.constant 0 : index
    %c7 = arith.constant 7 : index
    %c0_38 = arith.constant 0 : index
    %c0_39 = arith.constant 0 : index
    %52 = vector.load %arg5[%c0_37, %c7, %c0_38, %c0_39] : memref<1x8x16x16xf32, #tpu.memory_space<vmem>>, vector<1x1x16x16xf32>
    %53 = vector.shape_cast %52 : vector<1x1x16x16xf32> to vector<16x16xf32>
    %54 = vector.shape_cast %51 : vector<16x16xf32> to vector<1x1x16x16xf32>
    tpu.vector_store %arg5[%c0_37, %c7, %c0_38, %c0_39], %54 {strides = array<i32>} : memref<1x8x16x16xf32, #tpu.memory_space<vmem>>, vector<1x1x16x16xf32>,
    return
  }
  func.func @transform_0(%arg0: i32, %arg1: i32) -> (i32, i32, i32, i32) {
    %c0_i32 = arith.constant 0 : i32
    %c0_i32_0 = arith.constant 0 : i32
    %c0_i32_1 = arith.constant 0 : i32
    %c0_i32_2 = arith.constant 0 : i32
    return %arg0, %c0_i32, %c0_i32_0, %c0_i32_1 : i32, i32, i32, i32
  }
  func.func @transform_1(%arg0: i32, %arg1: i32) -> (i32, i32) {
    %c0_i32 = arith.constant 0 : i32
    %c0_i32_0 = arith.constant 0 : i32
    return %arg1, %c0_i32 : i32, i32
  }
  func.func @transform_2(%arg0: i32, %arg1: i32) -> (i32, i32) {
    %c0_i32 = arith.constant 0 : i32
    %c0_i32_0 = arith.constant 0 : i32
    %c0_i32_1 = arith.constant 0 : i32
    return %c0_i32, %c0_i32_0 : i32, i32
  }
  func.func @transform_3(%arg0: i32, %arg1: i32) -> (i32, i32, i32, i32) {
    %c0_i32 = arith.constant 0 : i32
    %c0_i32_0 = arith.constant 0 : i32
    %c0_i32_1 = arith.constant 0 : i32
    return %arg0, %c0_i32, %arg1, %c0_i32_0 : i32, i32, i32, i32
  }
}

</mosaic_0001>

<bundles_post_ra>
// kernel: floorplan_forward.3
= control target key start
LH: loop header
LB: loop body
LE: loop exit
PB: predicated region body
PF: predicated region fallthrough
CT: control target
= control target key end

     0   :  { %s1231_s12 = smov 0   ;;  %s1233_s13 = smov 0   ;;  %s1488_s0 = inlined_call_operand.vmem [shape: bf16[2,9,2,9,6], index: 0, kind: input, shape index: {}]   ;;  %s1489_s1 = inlined_call_operand.vmem [shape: bf16[27,16], index: 1, kind: input, shape index: {}]   ;;  %s1490_s2 = inlined_call_operand.vmem [shape: f32[1,16], index: 2, kind: input, shape index: {}]   ;;  %s1491_s3 = inlined_call_operand.vmem [shape: bf16[2,8,8,16], index: 3, kind: output, shape index: {}]  }
   0x1   :  { %s1235_s14 = smov 0  }
   0x2 LB: > { %s25_s15 = sadd.s32 1, %s1199_s13  ;;  %p996_p0 = scmp.ge.s32.totalorder %s1203_s14, 1  ;;  %s1203_s14 = sphi %s1235_s14, %s13_s14   ;;  %s1199_s13 = sphi %s1233_s13, %s1493_s13   ;;  %s1195_s12 = sphi %s1231_s12, %s1492_s12  }
   0x3   : > { %p27_p1 = scmp.ge.s32.totalorder %s25_s15, 2  ;;  %p151_p2 = scmp.lt.s32.totalorder %s1203_s14, 3 }
   0x5   : > { %s1495_s15 = smov (%p27_p1, %s25_s15), 0  ;;  %p152_p3 = pnand %p996_p0, %p151_p2 }
   0x6   : > { %p179_p4 = scmp.lt.s32.totalorder (!%p152_p3), %s1195_s12, 1  ;;  %s1205_s20 = smov (!%p152_p3), 9   ;;  %vm804_vm0 = vcmask (!%p152_p3), 1044480   ;;  %vm805_vm1 = vcmask (!%p152_p3), 1045504   ;;  %vm646_vm2 = vcmask (!%p152_p3), 48128   ;;  %vm663_vm3 = vcmask (!%p152_p3), 72704  }
   0x7   : > { %155 = sbr.rel (%p152_p3) target bundleno = 441 (0x1b9), region = 32  ;;  %s1206_s21 = smov (!%p152_p3), 6   ;;  %vm680_vm4 = vcmask (!%p152_p3), 97280   ;;  %vm689_vm5 = vcmask (!%p152_p3), 121856   ;;  %vm706_vm6 = vcmask (!%p152_p3), 146432   ;;  %vm723_vm7 = vcmask (!%p152_p3), 171008  }
   0x8   : > { %s1207_s22 = smov (!%p152_p3), 15   ;;  %s1208_s23 = smov (!%p152_p3), 18   ;;  %vm732_vm8 = vcmask (!%p152_p3), 195584   ;;  %vm791_vm9 = vcmask (!%p152_p3), 220160   ;;  %vm892_vm10 = vcmask (!%p152_p3), 125952  }
   0x9   : > { %s1210_s28 = smov (!%p152_p3), 24  }
   0xe   : > { %s1497_s12 = smov (!%p179_p4, %s1195_s12), 1 }
   0xf   : > { %s1108_s16 = smul.u32 144, %s1497_s12  ;;  %s1085_s4 = sshll.u32 %s1497_s12, 5 }
  0x10   : > { %s1461_s7 = scalar_lea.vmem %s1491_s3, %s1085_s4 }
  0x11   : > { %s1255_s19 = scalar_lea.vmem %s1488_s0, %s1108_s16 }
  0x12   : > { %v1258_v0 = vld [vmem:[%s1255_s19 + $0x18] sm:$0xf]  ;;  %v1261_v1 = vld [vmem:[%s1255_s19 + $0x8] sm:$0xf]  ;;  %v1268_v4 = vld [vmem:[%s1255_s19 + $0x40] sm:$0xf] }
  0x13   : > { %v1041_v2 = vcombine.low %v1258_v0, %v1258_v0  ;;  %v1040_v3 = vcombine.low %v1261_v1, %v1261_v1  ;;  %v211_v5 = vld [vmem:[%s1255_s19 + $0x44] sm:$0x1]  ;;  %v1273_v7 = vld [vmem:[%s1255_s19] sm:$0xf]  ;;  %v1277_v9 = vld [vmem:[%s1255_s19 + $0x50] sm:$0xf] }
  0x14   : > { %v1036_v6 = vcombine.low %v1268_v4, %v211_v5  ;;  %v207_v8 = vld [vmem:[%s1255_s19 + $0x4] sm:$0x1]  ;;  %v212_v11 = vld [vmem:[%s1255_s19 + $0x54] sm:$0x1]  ;;  %v1284_v12 = vld [vmem:[%s1255_s19 + $0x10] sm:$0xf] }
  0x15   : > { %392 = vrot.lane.b32.xlu1 %v1041_v2, %s1205_s20  ;;  %390 = vrot.lane.b32.xlu0 %v1040_v3, %s1205_s20  ;;  %v1032_v10 = vcombine.low %v1273_v7, %v207_v8  ;;  %v208_v15 = vld [vmem:[%s1255_s19 + $0x14] sm:$0x1]  ;;  %v1037_v18 = vcombine.low %v1277_v9, %v212_v11  ;;  %v1290_v20 = vld [vmem:[%s1255_s19 + $0x30] sm:$0xf] }
  0x16   : > { %v323_v13 = vshrl.u32 %v1036_v6, 16  ;;  %v325_v14 = vshll.u32 %v1036_v6, 16  ;;  %v1033_v19 = vcombine.low %v1284_v12, %v208_v15  ;;  %v210_v21 = vld [vmem:[%s1255_s19 + $0x34] sm:$0x1]  ;;  %v1295_v24 = vld [vmem:[%s1255_s19 + $0x20] sm:$0xf] }
  0x17   : > { %v295_v16 = vshrl.u32 %v1032_v10, 16  ;;  %v297_v17 = vshll.u32 %v1032_v10, 16  ;;  %v1035_v23 = vcombine.low %v1290_v20, %v210_v21  ;;  %v209_v25 = vld [vmem:[%s1255_s19 + $0x24] sm:$0x1]  ;;  %v330_v27 = vshrl.u32 %v1037_v18, 16 }
  0x18   : > { %v327_v22 = vrot.slane %v325_v14, 1  ;;  %v332_v28 = vshll.u32 %v1037_v18, 16  ;;  %v1299_v29 = vld [vmem:[%s1255_s19 + $0x70] sm:$0xf]  ;;  %v302_v31 = vshrl.u32 %v1033_v19, 16  ;;  %v304_v32 = vshll.u32 %v1033_v19, 16 }
  0x19   : > { %v299_v26 = vrot.slane %v297_v17, 1  ;;  %v318_v33 = vshll.u32 %v1035_v23, 16  ;;  %v214_v34 = vld [vmem:[%s1255_s19 + $0x74] sm:$0x1]  ;;  %v1034_v37 = vcombine.low %v1295_v24, %v209_v25  ;;  %v1305_v39 = vld [vmem:[%s1255_s19 + $0x60] sm:$0xf] }
  0x1a   : > { %v328_v30 = vor.u32 %v327_v22, %v323_v13  ;;  %v334_v36 = vrot.slane %v332_v28, 1  ;;  %v1039_v38 = vcombine.low %v1299_v29, %v214_v34  ;;  %v213_v40 = vld [vmem:[%s1255_s19 + $0x64] sm:$0x1]  ;;  %v306_v41 = vrot.slane %v304_v32, 1  ;;  %v1009_v58 = vld [vmem:[%s1255_s19 + $0x1c] sm:$0x1] }
  0x1b   : > { %v300_v35 = vor.u32 %v299_v26, %v295_v16  ;;  %v316_v42 = vshrl.u32 %v1035_v23, 16  ;;  %v320_v43 = vrot.slane %v318_v33, 1  ;;  %v1038_v44 = vcombine.low %v1305_v39, %v213_v40  ;;  %v1005_v61 = vld [vmem:[%s1255_s19 + $0x58] sm:$0xf]  ;;  %v1008_v62 = vld [vmem:[%s1255_s19 + $0xc] sm:$0x1] }
  0x1c   : > { %358 = vrot.lane.b32.xlu1 %v328_v30, %s1206_s21  ;;  %v335_v45 = vor.u32 %v334_v36, %v330_v27  ;;  %v309_v46 = vshrl.u32 %v1034_v37, 16  ;;  %v311_v47 = vshll.u32 %v1034_v37, 16  ;;  %v307_v48 = vor.u32 %v306_v41, %v302_v31  ;;  %v1004_v63 = vld [vmem:[%s1255_s19 + $0x48] sm:$0xf]  ;;  %v1013_v6 = vld [vmem:[%s1255_s19 + $0x5c] sm:$0x1] }
  0x1d   : > { %350 = vrot.lane.b32.xlu0 %v300_v35, %s1206_s21  ;;  %v346_v49 = vshll.u32 %v1039_v38, 16  ;;  %v339_v51 = vshll.u32 %v1038_v44, 16  ;;  %v321_v52 = vor.u32 %v320_v43, %v316_v42  ;;  %v344_v53 = vshrl.u32 %v1039_v38, 16  ;;  %v1003_v10 = vld [vmem:[%s1255_s19 + $0x38] sm:$0xf] }
  0x1e   : > { %v313_v50 = vrot.slane %v311_v47, 1  ;;  %v337_v56 = vshrl.u32 %v1038_v44, 16  ;;  %v1049_v2 = vcombine.low %v1258_v0, %v1009_v58  ;;  %v1045_v3 = vcombine.low %v1005_v61, %v1005_v61  ;;  %v1012_v11 = vld [vmem:[%s1255_s19 + $0x4c] sm:$0x1]  ;;  %v1002_v13 = vld [vmem:[%s1255_s19 + $0x28] sm:$0xf] }
  0x1f   : > { %v348_v54 = vrot.slane %v346_v49, 1  ;;  %v341_v57 = vrot.slane %v339_v51, 1  ;;  %v1048_v5 = vcombine.low %v1261_v1, %v1008_v62  ;;  %v1044_v8 = vcombine.low %v1004_v63, %v1004_v63  ;;  %v1011_v1 = vld [vmem:[%s1255_s19 + $0x3c] sm:$0x1]  ;;  %v1007_v19 = vld [vmem:[%s1255_s19 + $0x78] sm:$0xf] }
  0x20   : > { %360 = vrot.lane.b32.xlu1 %v335_v45, %s1206_s21  ;;  %v314_v55 = vor.u32 %v313_v50, %v309_v46  ;;  %v440_v14 = vshll.u32 %v1049_v2, 16  ;;  %v1053_v15 = vcombine.low %v1005_v61, %v1013_v6  ;;  %v1043_v0 = vcombine.low %v1003_v10, %v1003_v10  ;;  %v1010_v21 = vld [vmem:[%s1255_s19 + $0x2c] sm:$0x1]  ;;  %v1006_v22 = vld [vmem:[%s1255_s19 + $0x68] sm:$0xf] }
  0x21   : > { %352 = vrot.lane.b32.xlu0 %v307_v48, %s1206_s21  ;;  %v349_v59 = vor.u32 %v348_v54, %v344_v53  ;;  %v342_v60 = vor.u32 %v341_v57, %v337_v56  ;;  %v433_v16 = vshll.u32 %v1048_v5, 16  ;;  %v1052_v17 = vcombine.low %v1004_v63, %v1012_v11  ;;  %v1015_v28 = vld [vmem:[%s1255_s19 + $0x7c] sm:$0x1]  ;;  %v1014_v33 = vld [vmem:[%s1255_s19 + $0x6c] sm:$0x1] }
  0x22   : > { %v1042_v18 = vcombine.low %v1002_v13, %v1002_v13  ;;  %v438_v23 = vshrl.u32 %v1049_v2, 16  ;;  %v442_v25 = vrot.slane %v440_v14, 1  ;;  %v431_v26 = vshrl.u32 %v1048_v5, 16  ;;  %v1017_v2 = vld [vmem:[%s1255_s19 + $0x20] sm:$0xf] }
  0x23   : > { %v1051_v27 = vcombine.low %v1003_v10, %v1011_v1  ;;  %v1047_v30 = vcombine.low %v1007_v19, %v1007_v19  ;;  %v468_v31 = vshll.u32 %v1053_v15, 16  ;;  %v1050_v32 = vcombine.low %v1002_v13, %v1010_v21  ;;  %v1025_v6 = vld [vmem:[%s1255_s19 + $0x24] sm:$0x1]  ;;  %v1021_v10 = vld [vmem:[%s1255_s19 + $0x60] sm:$0xf] }
  0x24   : > { %356 = vrot.lane.b32.xlu1 %v321_v52, %s1206_s21  ;;  %v1046_v34 = vcombine.low %v1006_v22, %v1006_v22  ;;  %v435_v35 = vrot.slane %v433_v16, 1  ;;  %v461_v36 = vshll.u32 %v1052_v17, 16  ;;  %v1055_v37 = vcombine.low %v1007_v19, %v1015_v28  ;;  %v1024_v11 = vld [vmem:[%s1255_s19 + $0x14] sm:$0x1]  ;;  %v1020_v13 = vld [vmem:[%s1255_s19 + $0x50] sm:$0xf] }
  0x25   : > { %354 = vrot.lane.b32.xlu0 %v314_v55, %s1206_s21  ;;  %v443_v38 = vor.u32 %v442_v25, %v438_v23  ;;  %v1054_v40 = vcombine.low %v1006_v22, %v1014_v33  ;;  %v466_v41 = vshrl.u32 %v1053_v15, 16  ;;  %v470_v42 = vrot.slane %v468_v31, 1  ;;  %v1029_v16 = vld [vmem:[%s1255_s19 + $0x64] sm:$0x1]  ;;  %v1019_v1 = vld [vmem:[%s1255_s19 + $0x40] sm:$0xf] }
  0x26   : > { %v454_v43 = vshll.u32 %v1051_v27, 16  ;;  %v436_v44 = vor.u32 %v435_v35, %v431_v26  ;;  %v459_v45 = vshrl.u32 %v1052_v17, 16  ;;  %v463_v46 = vrot.slane %v461_v36, 1  ;;  %v1018_v19 = vld [vmem:[%s1255_s19 + $0x30] sm:$0xf] }
  0x27   : > { %v447_v47 = vshll.u32 %v1050_v32, 16  ;;  %v471_v48 = vor.u32 %v470_v42, %v466_v41  ;;  %v452_v49 = vshrl.u32 %v1051_v27, 16  ;;  %v482_v51 = vshll.u32 %v1055_v37, 16  ;;  %v1027_v21 = vld [vmem:[%s1255_s19 + $0x44] sm:$0x1] }
  0x28   : > { %364 = vrot.lane.b32.xlu1 %v349_v59, %s1206_s21  ;;  %v456_v50 = vrot.slane %v454_v43, 1  ;;  %v464_v52 = vor.u32 %v463_v46, %v459_v45  ;;  %v445_v53 = vshrl.u32 %v1050_v32, 16  ;;  %v475_v55 = vshll.u32 %v1054_v40, 16  ;;  %v1026_v22 = vld [vmem:[%s1255_s19 + $0x34] sm:$0x1] }
  0x29   : > { %362 = vrot.lane.b32.xlu0 %v342_v60, %s1206_s21  ;;  %v449_v54 = vrot.slane %v447_v47, 1  ;;  %v480_v57 = vshrl.u32 %v1055_v37, 16  ;;  %v484_v58 = vrot.slane %v482_v51, 1  ;;  %v473_v60 = vshrl.u32 %v1054_v40, 16  ;;  %v1023_v26 = vld [vmem:[%s1255_s19 + $0x80] sm:$0xf] }
  0x2a   : > { %v457_v56 = vor.u32 %v456_v50, %v452_v49  ;;  %v477_v61 = vrot.slane %v475_v55, 1  ;;  %v1057_v5 = vcombine.low %v1017_v2, %v1017_v2  ;;  %v1065_v14 = vcombine.low %v1017_v2, %v1025_v6  ;;  %v1022_v27 = vld [vmem:[%s1255_s19 + $0x70] sm:$0xf]  ;;  %v1031_v36 = vld [vmem:[%s1255_s19 + $0x84] sm:$0x1] }
  0x2b   : > { %v450_v59 = vor.u32 %v449_v54, %v445_v53  ;;  %v485_v62 = vor.u32 %v484_v58, %v480_v57  ;;  %v1061_v15 = vcombine.low %v1021_v10, %v1021_v10  ;;  %v1060_v17 = vcombine.low %v1020_v13, %v1020_v13  ;;  %v1180_v40 = vld [vmem:[%s1489_s1 + $0x8] sm:$0x3f]   ;;  %v1030_v43 = vld [vmem:[%s1255_s19 + $0x74] sm:$0x1] }
  0x2c   : > { %400 = vrot.lane.b32.xlu1 %v1045_v3, %s1205_s20  ;;  %v478_v63 = vor.u32 %v477_v61, %v473_v60  ;;  %v1016_v3 = vld [vmem:[%s1255_s19 + $0x10] sm:$0xf]  ;;  %v1069_v23 = vcombine.low %v1021_v10, %v1029_v16  ;;  %v1059_v25 = vcombine.low %v1019_v1, %v1019_v1  ;;  %v576_v28 = vshll.u32 %v1065_v14, 16 }
  0x2d   : > { %398 = vrot.lane.b32.xlu0 %v1044_v8, %s1205_s20  ;;  %v1056_v8 = vcombine.low %v1016_v3, %v1016_v3  ;;  %v1058_v32 = vcombine.low %v1018_v19, %v1018_v19  ;;  %v1066_v35 = vcombine.low %v1018_v19, %v1026_v22  ;;  %v1063_v37 = vcombine.low %v1023_v26, %v1023_v26 }
  0x2e   : > { %v1209_v41 = vmov 65535   ;;  %v578_v45 = vrot.slane %v576_v28, 1  ;;  %v604_v46 = vshll.u32 %v1069_v23, 16  ;;  %v1070_v53 = vcombine.low %v1022_v27, %v1030_v43 }
  0x2f   : > { %v806_v42 = vsel %vm804_vm0, 4294967295, %v1209_v41  ;;  %v602_v55 = vshrl.u32 %v1069_v23, 16  ;;  %v583_v61 = vshll.u32 %v1066_v35, 16  ;;  %v581_v6 = vshrl.u32 %v1066_v35, 16 }
  0x30   : > { %396 = vrot.lane.b32.xlu1 %v1043_v0, %s1205_s20  ;;  %v1064_v0 = vcombine.low %v1016_v3, %v1024_v11  ;;  %v807_v47 = vsel %vm805_vm1, %v806_v42, 0  ;;  %v611_v10 = vshll.u32 %v1070_v53, 16 }
  0x31   : > { %394 = vrot.lane.b32.xlu0 %v1042_v18, %s1205_s20  ;;  %v1028_v18 = vld [vmem:[%s1255_s19 + $0x54] sm:$0x1]  ;;  %v809_v51 = vand.u32 %v1180_v40, %v807_v47 }
  0x32   : > { %v1068_v31 = vcombine.low %v1020_v13, %v1028_v18  ;;  %v569_v33 = vshll.u32 %v1064_v0, 16  ;;  %v613_v16 = vrot.slane %v611_v10, 1 }
  0x34   : > { %404 = vrot.lane.b32.xlu1 %v1047_v30, %s1205_s20  ;;  %v1179_v30 = vld [vmem:[%s1489_s1] sm:$0xff]   ;;  %v571_v49 = vrot.slane %v569_v33, 1  ;;  %v597_v50 = vshll.u32 %v1068_v31, 16 }
  0x35   : > { %402 = vrot.lane.b32.xlu0 %v1046_v34, %s1205_s20  ;;  %v1067_v34 = vcombine.low %v1019_v1, %v1027_v21  ;;  %1092 = vmatprep.subr.bf16.mxu0 %v1179_v30 }
  0x36   : > { %1104 = vmatprep.subr.bf16.mxu1 %v1179_v30  ;;  %1093 = vmatpush3.bf16.msra.mxu0 %v1179_v30  ;;  %v599_v60 = vrot.slane %v597_v50, 1 }
  0x37   : > { %1106 = vmatpush3.bf16.msra.mxu1 %v1179_v30  ;;  %1094 = vmatprep.subr.bf16.mxu0 %v809_v51  ;;  %v590_v57 = vshll.u32 %v1067_v34, 16 }
  0x38   : > { %488 = vrot.lane.b32.xlu1 %v443_v38, %s1207_s22  ;;  %v1062_v38 = vcombine.low %v1022_v27, %v1022_v27  ;;  %1105 = vmatprep.subr.bf16.mxu1 %v809_v51 }
  0x39   : > { %486 = vrot.lane.b32.xlu0 %v436_v44, %s1207_s22  ;;  %v574_v44 = vshrl.u32 %v1065_v14, 16  ;;  %v592_v2 = vrot.slane %v590_v57, 1 }
  0x3a   : > { %1095 = vmatpush3.bf16.msra.mxu0 %v809_v51 }
  0x3b   : > { %v579_v54 = vor.u32 %v578_v45, %v574_v44  ;;  %1107 = vmatpush3.bf16.msra.mxu1 %v809_v51 }
  0x3c   : > { %496 = vrot.lane.b32.xlu1 %v471_v48, %s1207_s22  ;;  %v567_v48 = vshrl.u32 %v1064_v0, 16  ;;  %v609_v0 = vshrl.u32 %v1070_v53, 16 }
  0x3d   : > { %494 = vrot.lane.b32.xlu0 %v464_v52, %s1207_s22  ;;  %v1071_v52 = vcombine.low %v1023_v26, %v1031_v36 }
  0x3e   : > { %v572_v58 = vor.u32 %v571_v49, %v567_v48  ;;  %v614_v1 = vor.u32 %v613_v16, %v609_v0 }
  0x3f   : > { %v618_v3 = vshll.u32 %v1071_v52, 16  ;;  %v616_v13 = vshrl.u32 %v1071_v52, 16 }
  0x40   : > { %492 = vrot.lane.b32.xlu1 %v457_v56, %s1207_s22  ;;  %v606_v56 = vrot.slane %v604_v46, 1 }
  0x41   : > { %490 = vrot.lane.b32.xlu0 %v450_v59, %s1207_s22  ;;  %v595_v59 = vshrl.u32 %v1068_v31, 16  ;;  %v620_v14 = vrot.slane %v618_v3, 1 }
  0x44   : > { %500 = vrot.lane.b32.xlu1 %v485_v62, %s1207_s22  ;;  %v607_v62 = vor.u32 %v606_v56, %v602_v55 }
  0x45   : > { %498 = vrot.lane.b32.xlu0 %v478_v63, %s1207_s22  ;;  %v588_v63 = vshrl.u32 %v1067_v34, 16 }
  0x47   : > { %v593_v11 = vor.u32 %v592_v2, %v588_v63 }
  0x48   : > { %528 = vrot.lane.b32.xlu1 %v1057_v5, %s1208_s23  ;;  %v600_v5 = vor.u32 %v599_v60, %v595_v59 }
  0x49   : > { %526 = vrot.lane.b32.xlu0 %v1056_v8, %s1208_s23  ;;  %v585_v8 = vrot.slane %v583_v61, 1 }
  0x4c   : > { %536 = vrot.lane.b32.xlu1 %v1061_v15, %s1208_s23  ;;  %v586_v15 = vor.u32 %v585_v8, %v581_v6 }
  0x4d   : > { %534 = vrot.lane.b32.xlu0 %v1060_v17, %s1208_s23  ;;  %v621_v17 = vor.u32 %v620_v14, %v616_v13 }
  0x50   : > { %532 = vrot.lane.b32.xlu1 %v1059_v25, %s1208_s23 }
  0x51   : > { %530 = vrot.lane.b32.xlu0 %v1058_v32, %s1208_s23 }
  0x54   : > { %540 = vrot.lane.b32.xlu1 %v1063_v37, %s1208_s23 }
  0x55   : > { %538 = vrot.lane.b32.xlu0 %v1062_v38, %s1208_s23 }
  0x58   : > { %624 = vrot.lane.b32.xlu1 %v579_v54, %s1210_s28 }
  0x59   : > { %622 = vrot.lane.b32.xlu0 %v572_v58, %s1210_s28 }
  0x5c   : > { %632 = vrot.lane.b32.xlu1 %v607_v62, %s1210_s28 }
  0x5d   : > { %630 = vrot.lane.b32.xlu0 %v600_v5, %s1210_s28 }
  0x60   : > { %628 = vrot.lane.b32.xlu1 %v593_v11, %s1210_s28 }
  0x61   : > { %626 = vrot.lane.b32.xlu0 %v586_v15, %s1210_s28 }
  0x64   : > { %636 = vrot.lane.b32.xlu1 %v621_v17, %s1210_s28 }
  0x65   : > { %634 = vrot.lane.b32.xlu0 %v614_v1, %s1210_s28 }
  0x87   : > { %v393_v18 = vpop.permute.xlu1 %392  ;;  %v391_v19 = vpop.permute.xlu0 %390 }
  0x8e   : > { %v359_v21 = vpop.permute.xlu1 %358 }
  0x8f   : > { %v351_v22 = vpop.permute.xlu0 %350  ;;  %v656_v56 = vsel %vm646_vm2, %v1268_v4, %v359_v21 }
  0x90   : > { %v648_v51 = vsel %vm646_vm2, %v1273_v7, %v351_v22 }
  0x91   : > { %v665_v54 = vsel %vm663_vm3, %v648_v51, %v391_v19 }
  0x92   : > { %v361_v23 = vpop.permute.xlu1 %360  ;;  %v681_v60 = vsel %vm680_vm4, %v665_v54, %v391_v19 }
  0x93   : > { %v353_v25 = vpop.permute.xlu0 %352 }
  0x94   : > { %v650_v49 = vsel %vm646_vm2, %v1284_v12, %v353_v25  ;;  %v658_v12 = vsel %vm646_vm2, %v1277_v9, %v361_v23 }
  0x95   : > { %v667_v52 = vsel %vm663_vm3, %v650_v49, %v393_v18 }
  0x96   : > { %v357_v26 = vpop.permute.xlu1 %356  ;;  %v682_v57 = vsel %vm680_vm4, %v667_v52, %v393_v18 }
  0x97   : > { %v355_v27 = vpop.permute.xlu0 %354  ;;  %v654_v9 = vsel %vm646_vm2, %v1290_v20, %v357_v26 }
  0x98   : > { %v652_v3 = vsel %vm646_vm2, %v1295_v24, %v355_v27 }
  0x9a   : > { %v365_v28 = vpop.permute.xlu1 %364 }
  0x9b   : > { %v1369_v30 = vpop.permute.xlu0 %362  ;;  %v662_v17 = vsel %vm646_vm2, %v1299_v29, %v365_v28 }
  0x9c   : > { %v660_v19 = vsel %vm646_vm2, %v1305_v39, %v1369_v30 }
  0x9e   : > { %v401_v31 = vpop.permute.xlu1 %400 }
  0x9f   : > { %v399_v32 = vpop.permute.xlu0 %398  ;;  %v675_v58 = vsel %vm663_vm3, %v658_v12, %v401_v31 }
  0xa0   : > { %v673_v7 = vsel %vm663_vm3, %v656_v56, %v399_v32  ;;  %v686_v5 = vsel %vm680_vm4, %v675_v58, %v401_v31 }
  0xa1   : > { %v685_v6 = vsel %vm680_vm4, %v673_v7, %v399_v32 }
  0xa2   : > { %v397_v33 = vpop.permute.xlu1 %396 }
  0xa3   : > { %v395_v34 = vpop.permute.xlu0 %394  ;;  %v671_v8 = vsel %vm663_vm3, %v654_v9, %v397_v33 }
  0xa4   : > { %v669_v10 = vsel %vm663_vm3, %v652_v3, %v395_v34  ;;  %v684_v21 = vsel %vm680_vm4, %v671_v8, %v397_v33 }
  0xa5   : > { %v683_v22 = vsel %vm680_vm4, %v669_v10, %v395_v34 }
  0xa6   : > { %v1371_v35 = vpop.permute.xlu1 %404 }
  0xa7   : > { %v1373_v36 = vpop.permute.xlu0 %402  ;;  %v679_v25 = vsel %vm663_vm3, %v662_v17, %v1371_v35 }
  0xa8   : > { %v677_v29 = vsel %vm663_vm3, %v660_v19, %v1373_v36 }
  0xaa   : > { %v489_v37 = vpop.permute.xlu1 %488 }
  0xab   : > { %v487_v38 = vpop.permute.xlu0 %486  ;;  %v693_v59 = vsel %vm689_vm5, %v682_v57, %v489_v37  ;;  %v1072_v57 = vld [vmem:[%s1490_s2] ss:$0 sm:$0xff] }
  0xac   : > { %v691_v62 = vsel %vm689_vm5, %v681_v60, %v487_v38  ;;  %v688_v38 = vsel %vm680_vm4, %v679_v25, %v1371_v35 }
  0xae   : > { %v497_v40 = vpop.permute.xlu1 %496 }
  0xaf   : > { %v495_v41 = vpop.permute.xlu0 %494  ;;  %v701_v11 = vsel %vm689_vm5, %v686_v5, %v497_v40 }
  0xb0   : > { %v699_v15 = vsel %vm689_vm5, %v685_v6, %v495_v41  ;;  %v687_v41 = vsel %vm680_vm4, %v677_v29, %v1373_v36 }
  0xb2   : > { %v493_v42 = vpop.permute.xlu1 %492 }
  0xb3   : > { %v491_v43 = vpop.permute.xlu0 %490  ;;  %v697_v26 = vsel %vm689_vm5, %v684_v21, %v493_v42 }
  0xb4   : > { %v695_v31 = vsel %vm689_vm5, %v683_v22, %v491_v43 }
  0xb6   : > { %v1375_v44 = vpop.permute.xlu1 %500 }
  0xb7   : > { %v1377_v45 = vpop.permute.xlu0 %498  ;;  %v705_v42 = vsel %vm689_vm5, %v688_v38, %v1375_v44 }
  0xba   : > { %v529_v46 = vpop.permute.xlu1 %528 }
  0xbb   : > { %v527_v47 = vpop.permute.xlu0 %526  ;;  %v710_v63 = vsel %vm706_vm6, %v693_v59, %v529_v46 }
  0xbc   : > { %v708_v2 = vsel %vm706_vm6, %v691_v62, %v527_v47  ;;  %v725_v13 = vsel %vm723_vm7, %v710_v63, %v529_v46 }
  0xbd   : > { %v724_v20 = vsel %vm723_vm7, %v708_v2, %v527_v47  ;;  %v703_v47 = vsel %vm689_vm5, %v687_v41, %v1377_v45 }
  0xbe   : > { %v537_v48 = vpop.permute.xlu1 %536 }
  0xbf   : > { %v535_v50 = vpop.permute.xlu0 %534  ;;  %v718_v0 = vsel %vm706_vm6, %v701_v11, %v537_v48 }
  0xc0   : > { %v716_v1 = vsel %vm706_vm6, %v699_v15, %v535_v50  ;;  %v729_v27 = vsel %vm723_vm7, %v718_v0, %v537_v48 }
  0xc1   : > { %v728_v39 = vsel %vm723_vm7, %v716_v1, %v535_v50 }
  0xc2   : > { %v533_v53 = vpop.permute.xlu1 %532 }
  0xc3   : > { %v531_v55 = vpop.permute.xlu0 %530  ;;  %v714_v30 = vsel %vm706_vm6, %v697_v26, %v533_v53 }
  0xc4   : > { %v712_v34 = vsel %vm706_vm6, %v695_v31, %v531_v55  ;;  %v727_v43 = vsel %vm723_vm7, %v714_v30, %v533_v53 }
  0xc5   : > { %v726_v48 = vsel %vm723_vm7, %v712_v34, %v531_v55 }
  0xc6   : > { %v541_v61 = vpop.permute.xlu1 %540 }
  0xc7   : > { %v539_v4 = vpop.permute.xlu0 %538  ;;  %v722_v49 = vsel %vm706_vm6, %v705_v42, %v541_v61 }
  0xc8   : > { %v720_v36 = vsel %vm706_vm6, %v703_v47, %v539_v4  ;;  %v731_v52 = vsel %vm723_vm7, %v722_v49, %v541_v61 }
  0xc9   : > { %v730_v45 = vsel %vm723_vm7, %v720_v36, %v539_v4 }
  0xca   : > { %v625_v14 = vpop.permute.xlu1 %624 }
  0xcb   : > { %v736_v24 = vsel %vm732_vm8, %v725_v13, %v625_v14  ;;  %v623_v16 = vpop.permute.xlu0 %622 }
  0xcc   : > { %v734_v18 = vsel %vm732_vm8, %v724_v20, %v623_v16 }
  0xcd   : > { %v1073_v23 = vcombine.low %v734_v18, %v736_v24 }
  0xce   : > { %v633_v28 = vpop.permute.xlu1 %632 }
  0xcf   : > { %v744_v32 = vsel %vm732_vm8, %v729_v27, %v633_v28  ;;  %1096 = vmatprep.mubr.msk.bf16.mxu0 %vm791_vm9, %v1073_v23  ;;  %v631_v33 = vpop.permute.xlu0 %630 }
  0xd0   : > { %v742_v37 = vsel %vm732_vm8, %v728_v39, %v631_v33 }
  0xd1   : > { %v1075_v40 = vcombine.low %v742_v37, %v744_v32 }
  0xd2   : > { %v629_v46 = vpop.permute.xlu1 %628 }
  0xd3   : > { %v740_v50 = vsel %vm732_vm8, %v727_v43, %v629_v46  ;;  %1100 = vmatprep.mubr.msk.bf16.mxu1 %vm791_vm9, %v1075_v40  ;;  %v627_v35 = vpop.permute.xlu0 %626 }
  0xd4   : > { %v738_v44 = vsel %vm732_vm8, %v726_v48, %v627_v35 }
  0xd5   : > { %v1074_v51 = vcombine.low %v738_v44, %v740_v50 }
  0xd6   : > { %v637_v53 = vpop.permute.xlu1 %636 }
  0xd7   : > { %v748_v54 = vsel %vm732_vm8, %v731_v52, %v637_v53  ;;  %1097 = vmatmul.mubr.msk.bf16.vlgmr.msra.gmra.mrb[0].mxu0 %vm791_vm9, %v1074_v51  ;;  %v635_v55 = vpop.permute.xlu0 %634 }
  0xd8   : > { %v746_v56 = vsel %vm732_vm8, %v730_v45, %v635_v55 }
  0xd9   : > { %v1076_v12 = vcombine.low %v746_v56, %v748_v54 }
  0xdb   : > { %1101 = vmatmul.mubr.msk.bf16.vlgmr.msra.gmra.mrb[0].mxu1 %vm791_vm9, %v1076_v12 }
 0x1aa   : > { %v1098_v58 = vpop.f32.mrb[0].mxu0 }
 0x1ab   : > { %v854_v7 = vadd.f32 %v1098_v58, %v1072_v57  ;;  %v845_v59 = vpop.f32.mrb[1].mxu0 }
 0x1ac   : > { %v846_v60 = vadd.f32 %v1072_v57, %v845_v59  ;;  %v1099_v61 = vpop.f32.mrb[2].mxu0 }
 0x1ad   : > { %v878_v62 = vmax.f32 %v854_v7, 0.0  ;;  %v857_v63 = vadd.f32 %v1099_v61, %v1072_v57  ;;  %v848_v4 = vpop.f32.mrb[3].mxu0 }
 0x1ae   : > { %v876_v2 = vmax.f32 %v846_v60, 0.0  ;;  %v849_v9 = vadd.f32 %v1072_v57, %v848_v4  ;;  %v1102_v3 = vpop.f32.mrb[0].mxu1 }
 0x1af   : > { %v886_v5 = vpack.c.bf16 %v878_v62, %v878_v62  ;;  %v879_v6 = vmax.f32 %v857_v63, 0.0  ;;  %v870_v8 = vadd.f32 %v1102_v3, %v1072_v57  ;;  %v861_v10 = vpop.f32.mrb[1].mxu1 }
 0x1b0   : > { %v884_v11 = vpack.c.bf16 %v876_v2, %v876_v2  ;;  %v877_v13 = vmax.f32 %v849_v9, 0.0  ;;  %v862_v14 = vadd.f32 %v1072_v57, %v861_v10  ;;  %v1103_v15 = vpop.f32.mrb[2].mxu1 }
 0x1b1   : > { %895 = vst.msk [vmem:[%s1461_s7 + $0x8] sm:$0xf] %vm892_vm10, %v886_v5  ;;  %v887_v20 = vpack.c.bf16 %v879_v6, %v879_v6  ;;  %v882_v0 = vmax.f32 %v870_v8, 0.0  ;;  %v873_v24 = vadd.f32 %v1103_v15, %v1072_v57  ;;  %v864_v16 = vpop.f32.mrb[3].mxu1 }
 0x1b2   : > { %893 = vst.msk [vmem:[%s1461_s7] sm:$0xf] %vm892_vm10, %v884_v11  ;;  %v885_v17 = vpack.c.bf16 %v877_v13, %v877_v13  ;;  %v880_v1 = vmax.f32 %v862_v14, 0.0  ;;  %v865_v18 = vadd.f32 %v1072_v57, %v864_v16 }
 0x1b3   : > { %896 = vst.msk [vmem:[%s1461_s7 + $0xc] sm:$0xf] %vm892_vm10, %v887_v20  ;;  %v890_v19 = vpack.c.bf16 %v882_v0, %v882_v0  ;;  %v883_v21 = vmax.f32 %v873_v24, 0.0 }
 0x1b4   : > { %894 = vst.msk [vmem:[%s1461_s7 + $0x4] sm:$0xf] %vm892_vm10, %v885_v17  ;;  %v888_v22 = vpack.c.bf16 %v880_v1, %v880_v1  ;;  %v881_v23 = vmax.f32 %v865_v18, 0.0 }
 0x1b5   : > { %899 = vst.msk [vmem:[%s1461_s7 + $0x18] sm:$0xf] %vm892_vm10, %v890_v19  ;;  %v891_v25 = vpack.c.bf16 %v883_v21, %v883_v21 }
 0x1b6   : > { %897 = vst.msk [vmem:[%s1461_s7 + $0x10] sm:$0xf] %vm892_vm10, %v888_v22  ;;  %v889_v29 = vpack.c.bf16 %v881_v23, %v881_v23 }
 0x1b7   : > { %900 = vst.msk [vmem:[%s1461_s7 + $0x1c] sm:$0xf] %vm892_vm10, %v891_v25 }
 0x1b8   : > { %898 = vst.msk [vmem:[%s1461_s7 + $0x14] sm:$0xf] %vm892_vm10, %v889_v29 }
 0x1b9 PF: > { %s13_s14 = sadd.s32 1, %s1203_s14   ;;  %s1492_s12 = smov %s1199_s13 }
 0x1ba   : > { %p10_p5 = scmp.ge.s32.totalorder %s13_s14, 4   ;;  %s1493_s13 = smov %s1495_s15 }
 0x1bc   :  { %12 = sbr.rel (!%p10_p5) target bundleno = 2 (0x2), region = 65 }

// kernel: floorplan_forward.5
= control target key start
LH: loop header
LB: loop body
LE: loop exit
PB: predicated region body
PF: predicated region fallthrough
CT: control target
= control target key end

     0   :  { %8 = vsyncpa [#allocation3], 0  ;;  %s1586_s0 = inlined_call_operand.vmem [shape: f32[2,8,4,4], index: 0, kind: input, shape index: {}]   ;;  %s1587_s1 = inlined_call_operand.vmem [shape: f32[16,4], index: 1, kind: input, shape index: {}]   ;;  %s1588_s2 = inlined_call_operand.vmem [shape: f32[4,16], index: 2, kind: input, shape index: {}]   ;;  %s1589_s3 = inlined_call_operand.hbm [shape: f32[2,8,16,16], index: 3, kind: output, shape index: {}]  }
   0x1   :  { %10 = vsyncpa [#allocation3 + $0x1], 0  ;;  %s1385_s12 = smov 0   ;;  %s1387_s13 = smov 0  }
   0x2   :  { %s1389_s14 = smov 0   ;;  %s1391_s15 = smov 0  }
   0x3   :  { %s1393_s16 = smov 0   ;;  %s1395_s17 = smov 0  }
   0x4 LB: > { %s1085_s18 = sadd.s32 4294967295, %s1360_s17   ;;  %s1086_s19 = sadd.s32 4294967294, %s1360_s17   ;;  %s1360_s17 = sphi %s1395_s17, %s16_s17   ;;  %s1356_s16 = sphi %s1393_s16, %s1596_s16   ;;  %s1352_s15 = sphi %s1391_s15, %s1595_s15   ;;  %s1348_s14 = sphi %s1389_s14, %s1594_s14   ;;  %s1344_s13 = sphi %s1387_s13, %s1593_s13   ;;  %s1340_s12 = sphi %s1385_s12, %s1592_s12  }
   0x5   : > { %s28_s20 = sadd.s32 1, %s1356_s16  ;;  %s110_s21 = sadd.s32 1, %s1348_s14 }
   0x6   : > { %p30_p0 = scmp.ge.s32.totalorder %s28_s20, 2  ;;  %p120_p1 = scmp.ne.s32.totalorder %s1348_s14, %s1344_s13 }
   0x7   : > { %p121_p2 = scmp.eq.s32.totalorder %s1085_s18, 1  ;;  %p126_p3 = scmp.ne.s32.totalorder %s1344_s13, %s1340_s12 }
   0x8   : > { %s1598_s20 = smov (%p30_p0, %s28_s20), 0  ;;  %p127_p5 = scmp.eq.s32.totalorder %s1086_s19, 1 }
   0x9   : > { %p1425_p4 = por %p121_p2, %p120_p1  ;;  %s105_s23 = ssub.s32 %s1356_s16, %s1598_s20 }
   0xa   : > { %p1090_p6 = scmp.ge.s32.totalorder %s1360_s17, 1  ;;  %p108_p7 = scmp.eq.s32.totalorder %s105_s23, 0 }
   0xb   : > { %p1432_p8 = por %p127_p5, %p126_p3  ;;  %p165_p9 = scmp.lt.s32.totalorder %s1360_s17, 3 }
   0xc   : > { %s1438_s25 = scalar_select %p108_p7, %s1348_s14, %s110_s21  }
   0xd   : > { %p166_p10 = pnand %p1090_p6, %p165_p9 }
   0xe   : > { %v214_v0 = vld [vmem:[%s1588_s2] sm:$0xf] (!%p166_p10)  ;;  %vm236_vm0 = vcmask (!%p166_p10), 1043456   ;;  %p194_p11 = scmp.lt.s32.totalorder (!%p166_p10), %s1352_s15, 1  ;;  %vm227_vm1 = vcmask (!%p166_p10), 31744   ;;  %v334_v8 = vld [vmem:[%s1587_s1 + $0x8] sm:$0xff] (!%p166_p10) }
   0xf   : > { %169 = sbr.rel (%p166_p10) target bundleno = 487 (0x1e7), region = 32  ;;  %1173 = vmatprep.subr.msk.mxu0 (!%p166_p10), %vm236_vm0, %v214_v0  ;;  %v333_v5 = vld [vmem:[%s1587_s1] sm:$0xff] (!%p166_p10)  ;;  %s191_s10 = sand.u32 (!%p166_p10), 1, %s1344_s13   ;;  %vm418_vm2 = vcmask (!%p166_p10), 130048  }
  0x10   : > { %1174 = vmatpush3.msk.msra.mxu0 (!%p166_p10), %vm236_vm0, %v214_v0  ;;  %1183 = vmatprep.mubr.msk.f32.mxu1 (!%p166_p10), %vm227_vm1, %v333_v5  ;;  %s1091_s11 = sshll.u32 (!%p166_p10), %s191_s10, 7  ;;  %s1143_s19 = sshll.u32 (!%p166_p10), %s1352_s15, 11 }
  0x11   : > { %s1495_s18 = scalar_lea.vmem (!%p166_p10), [#allocation2], %s1091_s11  ;;  %s1530_s27 = scalar_lea.hbm (!%p166_p10), %s1589_s3, %s1143_s19 }
  0x12   : > { %s997_s21 = sshll.u32 (!%p166_p10), %s1495_s18, 4  ;;  %s1532_s21 = int_to_ptr.vmem [resolvable:$true] %s997_s21 }
  0x16   : > { %s195_s28 = scalar_select %p194_p11, %s1352_s15, 1 }
  0x17   : > { %s1540_s15 = scalar_lea.sflag [#allocation3], %s191_s10 }
  0x18   : > { %s1142_s29 = sshll.u32 %s195_s28, 5  ;;  %s1282_s28 = scalar_lea.vmem %s1532_s21, 2048 }
  0x19   : > { %s198_s5 = scalar_lea.vmem %s1586_s0, %s1142_s29  ;;  %p1283_p12 = scmp.ne.s32.totalorder %s1532_s21, %s1282_s28 }
  0x1a   : > { %v1278_v1 = vld [vmem:[%s198_s5] sm:$0xff]   ;;  %v1279_v2 = vld [vmem:[%s198_s5 + $0x8] sm:$0xff]   ;;  %v1280_v3 = vld [vmem:[%s198_s5 + $0x10] sm:$0xff]   ;;  %s1362_s29 = smov [#allocation2]  }
  0x1b   : > { %1175 = vmatprep.mubr.msk.f32.mxu0 %vm227_vm1, %v1278_v1  ;;  %v1281_v4 = vld [vmem:[%s198_s5 + $0x18] sm:$0xff]   ;;  %p1284_p13 = pnand %p1283_p12, %p1425_p4  ;;  %s1286_s30 = sshll.u32 %s1362_s29, 4  ;;  %s1287_s30 = int_to_ptr.vmem [resolvable:$false] %s1286_s30 }
  0x1c   : > { %1176 = vmatmul.mubr.msk.f32.vlgmr.msra.gmra.mrb[0].mxu0 %vm227_vm1, %v1279_v2  ;;  %s1288_s4 = scalar_lea.vmem %s1287_s30, 4096  ;;  %p1289_p1 = scmp.lt.s32.totalorder %s1532_s21, %s1287_s30 }
  0x1d   : > { %1178 = vmatprep.mubr.msk.f32.mxu0 %vm227_vm1, %v1280_v3  ;;  %p1285_p0 = pneg %p1284_p13  ;;  %p1290_p2 = scmp.lt.s32.totalorder %s1288_s4, %s1282_s28 }
  0x1f   : > { %p1291_p3 = por %p1290_p2, %p1289_p1 }
  0x20   : > { %1179 = vmatmul.mubr.msk.f32.gmra.mrb[2].mxu0 %vm227_vm1, %v1281_v4 }
  0x21   : > { %1193 = vmatprep.mubr.msk.f32.mxu0 %vm227_vm1, %v333_v5  ;;  %p1292_p5 = pnand %p1291_p3, %p1285_p0 }
  0xef   : > { %v1177_v6 = vpop.f32.mrb[0].mxu0 }
  0xf0   : > { %v306_v7 = vpop.f32.mrb[1].mxu0  ;;  %1191 = vmatprep.subr.msk.mxu0 %vm236_vm0, %v1177_v6  ;;  %v330_v10 = vcombine.high %v1177_v6, %v1177_v6 }
  0xf1   : > { %v329_v9 = vcombine.high %v306_v7, %v306_v7  ;;  %1181 = vmatprep.subr.msk.mxu1 %vm236_vm0, %v306_v7  ;;  %1192 = vmatpush3.msk.msra.mxu0 %vm236_vm0, %v1177_v6 }
  0xf2   : > { %1182 = vmatpush3.msk.msra.mxu1 %vm236_vm0, %v306_v7  ;;  %1194 = vmatmul.mubr.msk.f32.vlgmr.msra.gmra.mrb[4].mxu0 %vm227_vm1, %v334_v8 }
  0xf3   : > { %v1180_v11 = vpop.f32.mrb[2].mxu0  ;;  %1184 = vmatmul.mubr.msk.f32.vlgmr.msra.gmra.mrb[0].mxu1 %vm227_vm1, %v334_v8  ;;  %1186 = vmatprep.subr.msk.mxu1 %vm236_vm0, %v329_v9 }
  0xf4   : > { %v316_v12 = vpop.f32.mrb[3].mxu0  ;;  %1187 = vmatpush3.msk.msra.mxu1 %vm236_vm0, %v329_v9  ;;  %1188 = vmatprep.mubr.msk.f32.mxu1 %vm227_vm1, %v333_v5  ;;  %v332_v14 = vcombine.high %v1180_v11, %v1180_v11 }
  0xf5   : > { %1196 = vmatprep.subr.msk.mxu1 %vm236_vm0, %v330_v10  ;;  %1201 = vmatprep.subr.msk.mxu0 %vm236_vm0, %v316_v12  ;;  %v331_v13 = vcombine.high %v316_v12, %v316_v12 }
  0xf6   : > { %1202 = vmatpush3.msk.msra.mxu0 %vm236_vm0, %v316_v12  ;;  %1203 = vmatprep.mubr.msk.f32.mxu0 %vm227_vm1, %v333_v5 }
  0xf7   : > { %1189 = vmatmul.mubr.msk.f32.vlgmr.msra.gmra.mrb[2].mxu1 %vm227_vm1, %v334_v8  ;;  %1211 = vmatprep.subr.msk.mxu0 %vm236_vm0, %v1180_v11 }
  0xf8   : > { %1197 = vmatpush3.msk.msra.mxu1 %vm236_vm0, %v330_v10  ;;  %1204 = vmatmul.mubr.msk.f32.vlgmr.msra.gmra.mrb[6].mxu0 %vm227_vm1, %v334_v8 }
  0xf9   : > { %1212 = vmatpush3.msk.msra.mxu0 %vm236_vm0, %v1180_v11  ;;  %1198 = vmatprep.mubr.msk.f32.mxu1 %vm227_vm1, %v333_v5 }
  0xfa   : > { %1206 = vmatprep.subr.msk.mxu1 %vm236_vm0, %v331_v13  ;;  %1213 = vmatprep.mubr.msk.f32.mxu0 %vm227_vm1, %v333_v5 }
  0xfb   : > { %1199 = vmatmul.mubr.msk.f32.vlgmr.msra.gmra.mrb[4].mxu1 %vm227_vm1, %v334_v8 }
  0xfc   : > { %1207 = vmatpush3.msk.msra.mxu1 %vm236_vm0, %v331_v13  ;;  %1208 = vmatprep.mubr.msk.f32.mxu1 %vm227_vm1, %v333_v5 }
  0xfd   : > { %1216 = vmatprep.subr.msk.mxu1 %vm236_vm0, %v332_v14  ;;  %1214 = vmatmul.mubr.msk.f32.vlgmr.msra.gmra.mrb[8].mxu0 %vm227_vm1, %v334_v8 }
  0xff   : > { %1209 = vmatmul.mubr.msk.f32.vlgmr.msra.gmra.mrb[6].mxu1 %vm227_vm1, %v334_v8 }
 0x100   : > { %1217 = vmatpush3.msk.msra.mxu1 %vm236_vm0, %v332_v14  ;;  %1218 = vmatprep.mubr.msk.f32.mxu1 %vm227_vm1, %v333_v5 }
 0x103   : > { %1219 = vmatmul.mubr.msk.f32.vlgmr.msra.gmra.mrb[8].mxu1 %vm227_vm1, %v334_v8 }
 0x1c5   : > { %v1195_v15 = vpop.f32.mrb[4].mxu0 }
 0x1c6   : > { %v1185_v16 = vpop.f32.mrb[0].mxu1  ;;  %1111 = vst.msk [vmem:[%s1495_s18 + $0x28] sm:$0xff] %vm418_vm2, %v1195_v15  ;;  %v569_v17 = vpop.f32.mrb[5].mxu0 }
 0x1c7   : > { %420 = vst.msk [vmem:[%s1495_s18 + $0x8] sm:$0xff] %vm418_vm2, %v1185_v16  ;;  %v409_v18 = vpop.f32.mrb[1].mxu1  ;;  %1110 = vst.msk [vmem:[%s1495_s18 + $0x20] sm:$0xff] %vm418_vm2, %v569_v17 }
 0x1c8   : > { %419 = vst.msk [vmem:[%s1495_s18] sm:$0xff] %vm418_vm2, %v409_v18 }
 0x1ca   : > { %v1190_v19 = vpop.f32.mrb[2].mxu1 }
 0x1cb   : > { %1106 = vst.msk [vmem:[%s1495_s18 + $0x18] sm:$0xff] %vm418_vm2, %v1190_v19  ;;  %v489_v20 = vpop.f32.mrb[3].mxu1  ;;  %v1205_v21 = vpop.f32.mrb[6].mxu0 }
 0x1cc   : > { %1105 = vst.msk [vmem:[%s1495_s18 + $0x10] sm:$0xff] %vm418_vm2, %v489_v20  ;;  %1121 = vst.msk [vmem:[%s1495_s18 + $0x48] sm:$0xff] %vm418_vm2, %v1205_v21  ;;  %v729_v22 = vpop.f32.mrb[7].mxu0 }
 0x1cd   : > { %1120 = vst.msk [vmem:[%s1495_s18 + $0x40] sm:$0xff] %vm418_vm2, %v729_v22 }
 0x1ce   : > { %v1200_v23 = vpop.f32.mrb[4].mxu1 }
 0x1cf   : > { %1116 = vst.msk [vmem:[%s1495_s18 + $0x38] sm:$0xff] %vm418_vm2, %v1200_v23  ;;  %v649_v24 = vpop.f32.mrb[5].mxu1 }
 0x1d0   : > { %1115 = vst.msk [vmem:[%s1495_s18 + $0x30] sm:$0xff] %vm418_vm2, %v649_v24  ;;  %v1215_v25 = vpop.f32.mrb[8].mxu0 }
 0x1d1   : > { %1131 = vst.msk [vmem:[%s1495_s18 + $0x68] sm:$0xff] %vm418_vm2, %v1215_v25  ;;  %v889_v26 = vpop.f32.mrb[9].mxu0 }
 0x1d2   : > { %v1210_v27 = vpop.f32.mrb[6].mxu1  ;;  %1130 = vst.msk [vmem:[%s1495_s18 + $0x60] sm:$0xff] %vm418_vm2, %v889_v26 }
 0x1d3   : > { %1126 = vst.msk [vmem:[%s1495_s18 + $0x58] sm:$0xff] %vm418_vm2, %v1210_v27  ;;  %v809_v28 = vpop.f32.mrb[7].mxu1 }
 0x1d4   : > { %1125 = vst.msk [vmem:[%s1495_s18 + $0x50] sm:$0xff] %vm418_vm2, %v809_v28 }
 0x1d6   : > { %v1220_v29 = vpop.f32.mrb[8].mxu1 }
 0x1d7   : > { %1136 = vst.msk [vmem:[%s1495_s18 + $0x78] sm:$0xff] %vm418_vm2, %v1220_v29  ;;  %v969_v30 = vpop.f32.mrb[9].mxu1 }
 0x1d8   : > { %1135 = vst.msk [vmem:[%s1495_s18 + $0x70] sm:$0xff] %vm418_vm2, %v969_v30 }
 0x1d9   : > { %1295 = shalt.err (!%p1292_p5)
}
 0x1da   : > { %s1296_s5 = scalar_lea.hbm %s1530_s27, 2048  ;;  %s1300_s8 = scalar_lea.hbm %s1589_s3, 4096 }
 0x1db   : > { %p1297_p6 = scmp.ne.s32.totalorder %s1530_s27, %s1296_s5  ;;  %p1301_p10 = scmp.lt.u32.totalorder %s1530_s27, %s1589_s3 }
 0x1dc   : > { %p1302_p11 = scmp.lt.u32.totalorder %s1300_s8, %s1296_s5  ;;  %p1304_p13 = scmp.lt.u32.totalorder %s1296_s5, %s1530_s27 }
 0x1dd   : > { %p1298_p7 = pnand %p1297_p6, %p1425_p4 }
 0x1de   : > { %p1303_p12 = por %p1302_p11, %p1301_p10 }
 0x1df   : > { %p1299_p9 = pneg %p1298_p7 }
 0x1e0   : > { %p1305_p0 = por %p1304_p13, %p1303_p12 }
 0x1e2   : > { %p1306_p1 = pnand %p1305_p0, %p1299_p9 }
 0x1e4   : > { %1309 = shalt.err (!%p1306_p1)
}
 0x1e5   : > { %s1363_s11 = smov 128   ;;  %s1364_s18 = smov 8  }
 0x1e6   : > { %1221 = dma.vmem_to_hbm [thread:$0]  (%p1425_p4), %s1532_s21, 2048, %s1530_s27, %s1540_s15, %s1363_s11, %s1363_s11, %s1364_s18  }
 0x1e7 PF: > { %p1227_p2 = scmp.ge.s32.totalorder %s1360_s17, 2  ;;  %s1012_s19 = sand.u32 1, %s1340_s12  }
 0x1e8   : > { %s1013_s23 = scalar_lea.sflag [#allocation3], %s1012_s19 }
 0x1e9   : > { %p1224_p3 = pnand %p1227_p2, %p1432_p8 }
 0x1eb   : > { %1335 = dma.done.wait (!%p1224_p3), %s1013_s23, 2048  }
 0x1ec   : > { %1337 = vsyncadd (!%p1224_p3), %s1013_s23, 4294965248  ;;  %s16_s17 = sadd.s32 1, %s1360_s17   ;;  %s1592_s12 = smov %s1344_s13 }
 0x1ed   : > { %p13_p5 = scmp.ge.s32.totalorder %s16_s17, 4   ;;  %s1593_s13 = smov %s1348_s14 }
 0x1ee   : > { %s1594_s14 = smov %s1438_s25  ;;  %s1595_s15 = smov %s1356_s16 }
 0x1ef   : > { %s1596_s16 = smov %s1598_s20  ;;  %15 = sbr.rel (!%p13_p5) target bundleno = 4 (0x4), region = 77 }
 0x1f6   :  { %1018 = vsyncpa [#allocation3], 1 }
 0x1f7   :  { %1020 = vsyncpa [#allocation3 + $0x1], 1 }

// kernel: floorplan_forward.4
= control target key start
LH: loop header
LB: loop body
LE: loop exit
PB: predicated region body
PF: predicated region fallthrough
CT: control target
= control target key end

     0   :  { %s1995_s24 = smov 0   ;;  %s1997_s25 = smov 0   ;;  %s2423_s0 = inlined_call_operand.vmem [shape: bf16[2,5,2,5,32], index: 0, kind: input, shape index: {}]   ;;  %s2424_s1 = inlined_call_operand.vmem [shape: bf16[144,18], index: 1, kind: input, shape index: {}]   ;;  %s2425_s2 = inlined_call_operand.vmem [shape: f32[1,18], index: 2, kind: input, shape index: {}]   ;;  %s2426_s3 = inlined_call_operand.vmem [shape: bf16[162,18], index: 3, kind: input, shape index: {}]   ;;  %s2427_s4 = inlined_call_operand.vmem [shape: f32[1,18], index: 4, kind: input, shape index: {}]   ;;  %s2428_s5 = inlined_call_operand.vmem [shape: bf16[18,8], index: 5, kind: input, shape index: {}]   ;;  %s2429_s6 = inlined_call_operand.vmem [shape: f32[1,8], index: 6, kind: input, shape index: {}]   ;;  %s2430_s7 = inlined_call_operand.vmem [shape: f32[2,8,4,4], index: 7, kind: output, shape index: {}]  }
   0x1   :  { %s1999_s26 = smov 0  }
   0x2 LB: > { %s29_s27 = sadd.s32 1, %s1926_s25  ;;  %p1686_p0 = scmp.ge.s32.totalorder %s1930_s26, 1  ;;  %s1930_s26 = sphi %s1999_s26, %s17_s26   ;;  %s1926_s25 = sphi %s1997_s25, %s2434_s25   ;;  %s1922_s24 = sphi %s1995_s24, %s2433_s24  }
   0x3   : > { %p31_p1 = scmp.ge.s32.totalorder %s29_s27, 2  ;;  %p251_p2 = scmp.lt.s32.totalorder %s1930_s26, 3 }
   0x5   : > { %s2436_s27 = smov (%p31_p1, %s29_s27), 0  ;;  %p252_p3 = pnand %p1686_p0, %p251_p2 }
   0x6   : > { %p286_p4 = scmp.lt.s32.totalorder (!%p252_p3), %s1922_s24, 1  ;;  %v1876_v0 = vld [vmem:[%s2424_s1] sm:$0xff] (!%p252_p3)   ;;  %v1932_v1 = vmov (!%p252_p3), 0   ;;  %v1877_v3 = vld [vmem:[%s2424_s1 + $0x8] sm:$0xff] (!%p252_p3)   ;;  %s1933_s13 = smov (!%p252_p3), 48   ;;  %v1878_v8 = vld [vmem:[%s2424_s1 + $0x10] sm:$0xff] (!%p252_p3)   ;;  %v572_v47 = vlaneseq (!%p252_p3) }
   0x7   : > { %255 = sbr.rel (%p252_p3) target bundleno = 1255 (0x4e7), region = 48  ;;  %701 = vmatprep.subr.bf16.mxu0 (!%p252_p3), %v1932_v1  ;;  %1212 = vmatprep.subr.bf16.mxu1 (!%p252_p3), %v1932_v1  ;;  %s1934_s16 = smov (!%p252_p3), 32   ;;  %v1879_v46 = vld [vmem:[%s2424_s1 + $0x18] sm:$0xff] (!%p252_p3)   ;;  %v1880_v49 = vld [vmem:[%s2424_s1 + $0x20] sm:$0xff] (!%p252_p3)   ;;  %v1883_v55 = vld [vmem:[%s2424_s1 + $0x28] sm:$0xff] (!%p252_p3)   ;;  %vm518_vm0 = vcmask (!%p252_p3), 261120  }
   0x8   : > { %702 = vmatpush1.bf16.msra.mxu0 (!%p252_p3), %v1876_v0  ;;  %1830 = vset.pattern.permute.xlu0 (!%p252_p3), %v1932_v1  ;;  %s1935_s19 = smov (!%p252_p3), 80   ;;  %v2055_v51 = vshrl.u32 (!%p252_p3), %v572_v47, 7  ;;  %v1339_v52 = vand.u32 (!%p252_p3), 127, %v572_v47  ;;  %s1936_s28 = smov (!%p252_p3), 96   ;;  %v1886_v59 = vld [vmem:[%s2424_s1 + $0x30] sm:$0xff] (!%p252_p3)   ;;  %v1887_v60 = vld [vmem:[%s2424_s1 + $0x38] sm:$0xff] (!%p252_p3)  }
   0x9   : > { %703 = vmatprep.subr.bf16.mxu0 (!%p252_p3), %v1932_v1  ;;  %v1888_v61 = vld [vmem:[%s2424_s1 + $0x40] sm:$0xff] (!%p252_p3)   ;;  %vm527_vm1 = vcmask (!%p252_p3), 392192   ;;  %vm536_vm2 = vcmask (!%p252_p3), 523264   ;;  %vm541_vm3 = vcmask (!%p252_p3), 654336   ;;  %vm550_vm4 = vcmask (!%p252_p3), 785408   ;;  %s1940_s14 = smov (!%p252_p3), 36  }
   0xa   : > { %v2059_v54 = vsub.s32 (!%p252_p3), %v1339_v52, %v2055_v51  ;;  %vm559_vm5 = vcmask (!%p252_p3), 916480   ;;  %vm513_vm6 = vcmask (!%p252_p3), 130048   ;;  %vm304_vm7 = vcmask (!%p252_p3), 141312   ;;  %s1941_s15 = smov (!%p252_p3), 126   ;;  %s1942_s18 = smov (!%p252_p3), 54  }
   0xb   : > { %306 = vst.msk [vmem:[#allocation2 + $0x4] sm:$0x7] (!%p252_p3), %vm304_vm7, %v1932_v1  ;;  %307 = vst.msk [vmem:[#allocation2 + $0x8] sm:$0x7] (!%p252_p3), %vm304_vm7, %v1932_v1  ;;  %vm825_vm8 = vsmask.f32 (!%p252_p3), 2306 }
   0xc   : > { %704 = vmatpush1.bf16.msra.mxu0 (!%p252_p3), %v1877_v3  ;;  %308 = vst.msk [vmem:[#allocation2 + $0xc] sm:$0x7] (!%p252_p3), %vm304_vm7, %v1932_v1  ;;  %309 = vst.msk [vmem:[#allocation2 + $0x10] sm:$0x7] (!%p252_p3), %vm304_vm7, %v1932_v1  ;;  %s1943_s21 = smov (!%p252_p3), 90   ;;  %s1944_s9 = smov (!%p252_p3), 16  }
   0xd   : > { %705 = vmatprep.subr.bf16.mxu0 (!%p252_p3), %v1932_v1  ;;  %305 = vst.msk [vmem:[#allocation2] sm:$0x7] (!%p252_p3), %vm304_vm7, %v1932_v1  ;;  %310 = vst.msk [vmem:[#allocation2 + $0x14] sm:$0x7] (!%p252_p3), %vm304_vm7, %v1932_v1  ;;  %vm1208_vm10 = vcmask (!%p252_p3), 1040384   ;;  %vm978_vm11 = vcmask (!%p252_p3), 146432  }
   0xe   : > { %s2438_s24 = smov (!%p286_p4, %s1922_s24), 1  ;;  %vm2161_vm9 = vmand %vm304_vm7, %vm825_vm8  ;;  %vm991_vm12 = vcmask 293888   ;;  %vm1000_vm13 = vcmask 441344   ;;  %vm1009_vm14 = vcmask 588800   ;;  %vm1018_vm15 = vcmask 736256  }
   0xf   : > { %s1782_s30 = smul.u32 40, %s2438_s24  ;;  %vm1363_vm7 = vcmask 27648  }
  0x10   : > { %706 = vmatpush1.bf16.msra.mxu0 %v1878_v8 }
  0x11   : > { %s2026_s10 = scalar_lea.vmem %s2423_s0, %s1782_s30  ;;  %707 = vmatprep.subr.bf16.mxu0 %v1932_v1 }
  0x12   : > { %v1860_v2 = vld [vmem:[%s2026_s10 + $0xc] ss:$0 sps:$4 sm:$0x33]   ;;  %v1861_v4 = vld [vmem:[%s2026_s10 + $0x4] ss:$0 sps:$4 sm:$0x33]  }
  0x13   : > { %399 = vrot.lane.b32.xlu1 %v1860_v2, %s1933_s13  ;;  %v1862_v5 = vld [vmem:[%s2026_s10 + $0x1c] ss:$0 sps:$4 sm:$0x33]   ;;  %397 = vrot.lane.b32.xlu0 %v1861_v4, %s1933_s13  ;;  %v1863_v6 = vld [vmem:[%s2026_s10 + $0x14] ss:$0 sps:$4 sm:$0x33]  }
  0x14   : > { %v1864_v7 = vld [vmem:[%s2026_s10 + $0x10] ss:$0 sps:$4 sm:$0x77]   ;;  %v1865_v9 = vld [vmem:[%s2026_s10] ss:$0 sps:$4 sm:$0x77]   ;;  %708 = vmatpush1.bf16.msra.mxu0 %v1879_v46 }
  0x15   : > { %v364_v10 = vshrl.u32 %v1864_v7, 16  ;;  %v366_v11 = vshll.u32 %v1864_v7, 16  ;;  %v350_v12 = vshrl.u32 %v1865_v9, 16  ;;  %v352_v13 = vshll.u32 %v1865_v9, 16  ;;  %709 = vmatprep.subr.bf16.mxu0 %v1932_v1  ;;  %v312_v8 = vld [vmem:[%s2026_s10 + $0x8] sm:$0x3] }
  0x16   : > { %v1866_v14 = vld [vmem:[%s2026_s10 + $0x18] ss:$0 sps:$4 sm:$0x77]   ;;  %v1867_v16 = vld [vmem:[%s2026_s10 + $0x8] ss:$0 sps:$4 sm:$0x77]  }
  0x17   : > { %403 = vrot.lane.b32.xlu1 %v1862_v5, %s1933_s13  ;;  %401 = vrot.lane.b32.xlu0 %v1863_v6, %s1933_s13  ;;  %v368_v15 = vrot.slane %v366_v11, 1  ;;  %v354_v17 = vrot.slane %v352_v13, 1  ;;  %v371_v18 = vshrl.u32 %v1866_v14, 16  ;;  %v373_v19 = vshll.u32 %v1866_v14, 16  ;;  %s1939_s13 = smov 108  }
  0x18   : > { %v1868_v20 = vld [vmem:[%s2026_s10 + $0xc] ss:$0 sps:$4 sm:$0x77]   ;;  %v357_v22 = vshrl.u32 %v1867_v16, 16  ;;  %v359_v23 = vshll.u32 %v1867_v16, 16  ;;  %710 = vmatpush1.bf16.msra.mxu0 %v1880_v49 }
  0x19   : > { %v369_v21 = vor.u32 %v368_v15, %v364_v10  ;;  %v355_v24 = vor.u32 %v354_v17, %v350_v12  ;;  %v375_v25 = vrot.slane %v373_v19, 1  ;;  %v425_v26 = vshrl.u32 %v1868_v20, 16  ;;  %v1869_v28 = vld [vmem:[%s2026_s10 + $0x4] ss:$0 sps:$4 sm:$0x77]   ;;  %711 = vmatprep.subr.bf16.mxu0 %v1932_v1 }
  0x1a   : > { %v427_v27 = vshll.u32 %v1868_v20, 16  ;;  %v361_v29 = vrot.slane %v359_v23, 1  ;;  %v1870_v30 = vld [vmem:[%s2026_s10 + $0x1c] ss:$0 sps:$4 sm:$0x77]   ;;  %v418_v33 = vshrl.u32 %v1869_v28, 16 }
  0x1b   : > { %381 = vrot.lane.b32.xlu1 %v369_v21, %s1934_s16  ;;  %377 = vrot.lane.b32.xlu0 %v355_v24, %s1934_s16  ;;  %v376_v31 = vor.u32 %v375_v25, %v371_v18  ;;  %v420_v34 = vshll.u32 %v1869_v28, 16  ;;  %v1871_v35 = vld [vmem:[%s2026_s10 + $0x14] ss:$0 sps:$4 sm:$0x77]   ;;  %v441_v37 = vshll.u32 %v1870_v30, 16  ;;  %v439_v41 = vshrl.u32 %v1870_v30, 16 }
  0x1c   : > { %v429_v32 = vrot.slane %v427_v27, 1  ;;  %v362_v36 = vor.u32 %v361_v29, %v357_v22  ;;  %v434_v39 = vshll.u32 %v1871_v35, 16  ;;  %v432_v44 = vshrl.u32 %v1871_v35, 16  ;;  %v1872_v53 = vld [vmem:[%s2026_s10 + $0x10] ss:$0 sps:$4 sm:$0x33]   ;;  %712 = vmatpush1.bf16.msra.mxu0 %v1883_v55 }
  0x1d   : > { %v422_v38 = vrot.slane %v420_v34, 1  ;;  %v443_v42 = vrot.slane %v441_v37, 1  ;;  %v1873_v56 = vld [vmem:[%s2026_s10 + $0x8] ss:$0 sps:$4 sm:$0x33]   ;;  %713 = vmatprep.subr.bf16.mxu0 %v1932_v1 }
  0x1e   : > { %v430_v40 = vor.u32 %v429_v32, %v425_v26  ;;  %v436_v45 = vrot.slane %v434_v39, 1  ;;  %v1874_v57 = vld [vmem:[%s2026_s10 + $0x20] ss:$0 sps:$4 sm:$0x33]   ;;  %v314_v20 = vld [vmem:[%s2026_s10 + $0x18] sm:$0x3] }
  0x1f   : > { %383 = vrot.lane.b32.xlu1 %v376_v31, %s1934_s16  ;;  %379 = vrot.lane.b32.xlu0 %v362_v36, %s1934_s16  ;;  %v423_v43 = vor.u32 %v422_v38, %v418_v33  ;;  %v444_v48 = vor.u32 %v443_v42, %v439_v41  ;;  %v1875_v58 = vld [vmem:[%s2026_s10 + $0x18] ss:$0 sps:$4 sm:$0x33]   ;;  %v1881_v5 = vld [vmem:[%s2026_s10 + $0x10] ss:$0 sps:$4 sm:$0x77]  }
  0x20   : > { %v437_v50 = vor.u32 %v436_v45, %v432_v44  ;;  %714 = vmatpush1.bf16.msra.mxu0 %v1886_v59  ;;  %v1882_v6 = vld [vmem:[%s2026_s10 + $0x8] ss:$0 sps:$4 sm:$0x77]   ;;  %v311_v10 = vld [vmem:[%s2026_s10] sm:$0x3]  ;;  %v495_v11 = vshll.u32 %v1881_v5, 16 }
  0x21   : > { %715 = vmatprep.subr.bf16.mxu0 %v1932_v1  ;;  %v488_v13 = vshll.u32 %v1882_v6, 16  ;;  %v1884_v14 = vld [vmem:[%s2026_s10 + $0x20] ss:$0 sps:$4 sm:$0x77]   ;;  %v493_v18 = vshrl.u32 %v1881_v5, 16  ;;  %v486_v26 = vshrl.u32 %v1882_v6, 16 }
  0x22   : > { %v1885_v16 = vld [vmem:[%s2026_s10 + $0x18] ss:$0 sps:$4 sm:$0x77]   ;;  %v497_v22 = vrot.slane %v495_v11, 1  ;;  %v1937_v23 = vmov 1983009808  }
  0x23   : > { %447 = vrot.lane.b32.xlu1 %v430_v40, %s1935_s19  ;;  %445 = vrot.lane.b32.xlu0 %v423_v43, %s1935_s19  ;;  %v570_v24 = vunpack.c.l.s4 %v1937_v23  ;;  %v313_v25 = vld [vmem:[%s2026_s10 + $0x10] sm:$0x3]  ;;  %v490_v27 = vrot.slane %v488_v13, 1  ;;  %v509_v28 = vshll.u32 %v1884_v14, 16  ;;  %v502_v30 = vshll.u32 %v1885_v16, 16  ;;  %s1938_s10 = smov 18  }
  0x24   : > { %716 = vmatpush1.bf16.msra.mxu0 %v1887_v60  ;;  %v498_v36 = vor.u32 %v497_v22, %v493_v18  ;;  %v507_v39 = vshrl.u32 %v1884_v14, 16  ;;  %v500_v41 = vshrl.u32 %v1885_v16, 16 }
  0x25   : > { %717 = vmatprep.subr.bf16.mxu0 %v1932_v1  ;;  %v571_v37 = vunpack.c.0.s8 %v570_v24  ;;  %v491_v38 = vor.u32 %v490_v27, %v486_v26  ;;  %v511_v40 = vrot.slane %v509_v28, 1  ;;  %v504_v46 = vrot.slane %v502_v30, 1 }
  0x27   : > { %451 = vrot.lane.b32.xlu1 %v444_v48, %s1935_s19  ;;  %449 = vrot.lane.b32.xlu0 %v437_v50, %s1935_s19  ;;  %v2105_v52 = vsub.s32 %v571_v37, %v2055_v51  ;;  %v512_v59 = vor.u32 %v511_v40, %v507_v39 }
  0x28   : > { %718 = vmatpush1.bf16.msra.mxu0 %v1888_v61 }
  0x2b   : > { %467 = vrot.lane.b32.xlu1 %v1872_v53, %s1936_s28  ;;  %465 = vrot.lane.b32.xlu0 %v1873_v56, %s1936_s28 }
  0x2f   : > { %471 = vrot.lane.b32.xlu1 %v1874_v57, %s1936_s28  ;;  %469 = vrot.lane.b32.xlu0 %v1875_v58, %s1936_s28 }
  0x85   : > { %v400_v62 = vpop.permute.xlu1 %399  ;;  %v398_v63 = vpop.permute.xlu0 %397 }
  0x89   : > { %v404_v0 = vpop.permute.xlu1 %403  ;;  %v2080_v2 = vpop.permute.xlu0 %401 }
  0x8d   : > { %v382_v3 = vpop.permute.xlu1 %381  ;;  %v378_v4 = vpop.permute.xlu0 %377 }
  0x8e   : > { %v520_v19 = vsel %vm518_vm0, %v311_v10, %v378_v4  ;;  %v524_v35 = vsel %vm518_vm0, %v313_v25, %v382_v3  ;;  %v505_v3 = vor.u32 %v504_v46, %v500_v41  ;;  %v2143_v25 = vld [vmem:[#allocation2 + $0x14] ss:$0 sps:$4 sm:$0x77]  }
  0x8f   : > { %v529_v31 = vsel %vm527_vm1, %v520_v19, %v398_v63  ;;  %v533_v47 = vsel %vm527_vm1, %v524_v35, %v2080_v2  ;;  %v2138_v19 = vld [vmem:[#allocation2] sm:$0x7]  ;;  %v955_v27 = vshrl.u32 %v2143_v25, 16  ;;  %v957_v28 = vshll.u32 %v2143_v25, 16  ;;  %952 = vrot.lane.b32.xlu1 %v2143_v25, %s1939_s13 }
  0x90   : > { %v537_v44 = vsel %vm536_vm2, %v529_v31, %v398_v63  ;;  %v539_v61 = vsel %vm536_vm2, %v533_v47, %v2080_v2  ;;  %v1726_v31 = vld [vmem:[%s2425_s2] ss:$0 sm:$0xff] }
  0x91   : > { %v384_v7 = vpop.permute.xlu1 %383  ;;  %v380_v9 = vpop.permute.xlu0 %379 }
  0x92   : > { %v522_v12 = vsel %vm518_vm0, %v312_v8, %v380_v9  ;;  %v526_v32 = vsel %vm518_vm0, %v314_v20, %v384_v7  ;;  %v1738_v20 = vcombine.low %v2138_v19, %v2138_v19  ;;  %vm1027_vm0 = vcmask 883712  }
  0x93   : > { %v531_v21 = vsel %vm527_vm1, %v522_v12, %v400_v62  ;;  %v535_v42 = vsel %vm527_vm1, %v526_v32, %v404_v0  ;;  %vm1036_vm1 = vcmask 1031168  }
  0x94   : > { %v538_v33 = vsel %vm536_vm2, %v531_v21, %v400_v62  ;;  %v540_v56 = vsel %vm536_vm2, %v535_v42, %v404_v0  ;;  %v863_v21 = vshll.u32 %v1738_v20, 16  ;;  %v861_v22 = vshrl.u32 %v1738_v20, 16 }
  0x95   : > { %v448_v15 = vpop.permute.xlu1 %447  ;;  %v446_v17 = vpop.permute.xlu0 %445  ;;  %v896_v26 = vrot.slane %v1738_v20, 1  ;;  %vm1204_vm2 = vcmask 277504  }
  0x96   : > { %v545_v43 = vsel %vm541_vm3, %v538_v33, %v448_v15  ;;  %v543_v48 = vsel %vm541_vm3, %v537_v44, %v446_v17  ;;  %v865_v23 = vrot.slane %v863_v21, 1  ;;  %v1895_v21 = vld [vmem:[%s2426_s3] sm:$0xff]  }
  0x97   : > { %1213 = vmatpush1.bf16.msra.mxu1 %v1895_v21 }
  0x98   : > { %v866_v24 = vor.u32 %v865_v23, %v861_v22  ;;  %1214 = vmatprep.subr.bf16.mxu1 %v1932_v1 }
  0x99   : > { %v452_v29 = vpop.permute.xlu1 %451  ;;  %v450_v34 = vpop.permute.xlu0 %449 }
  0x9a   : > { %v549_v60 = vsel %vm541_vm3, %v540_v56, %v452_v29  ;;  %v547_v51 = vsel %vm541_vm3, %v539_v61, %v450_v34  ;;  %888 = vrot.lane.b32.xlu0 %v866_v24, %s1938_s10  ;;  %v959_v29 = vrot.slane %v957_v28, 1  ;;  %v1896_v24 = vld [vmem:[%s2426_s3 + $0x8] sm:$0xff]   ;;  %v1898_v28 = vld [vmem:[%s2426_s3 + $0x18] sm:$0xff]   ;;  %vm1947_vm3 = vmmov 0  }
  0x9b   : > { %1215 = vmatpush1.bf16.msra.mxu1 %v1896_v24 }
  0x9c   : > { %v960_v30 = vor.u32 %v959_v29, %v955_v27  ;;  %1216 = vmatprep.subr.bf16.mxu1 %v1932_v1  ;;  %v1897_v27 = vld [vmem:[%s2426_s3 + $0x10] sm:$0xff]  }
  0x9d   : > { %v468_v45 = vpop.permute.xlu1 %467  ;;  %v466_v50 = vpop.permute.xlu0 %465 }
  0x9e   : > { %v554_v49 = vsel %vm550_vm4, %v545_v43, %v468_v45  ;;  %v552_v55 = vsel %vm550_vm4, %v543_v48, %v466_v50  ;;  %900 = vrot.lane.b32.xlu0 %v896_v26, %s1940_s14  ;;  %967 = vrot.lane.b32.xlu1 %v960_v30, %s1941_s15 }
  0x9f   : > { %v561_v53 = vsel %vm559_vm5, %v554_v49, %v468_v45  ;;  %v560_v58 = vsel %vm559_vm5, %v552_v55, %v466_v50  ;;  %1217 = vmatpush1.bf16.msra.mxu1 %v1897_v27 }
  0xa0   : > { %v576_v57 = vcombine.low %v561_v53, %v498_v36  ;;  %v568_v62 = vcombine.low %v560_v58, %v491_v38  ;;  %1218 = vmatprep.subr.bf16.mxu1 %v1932_v1 }
  0xa1   : > { %v472_v63 = vpop.permute.xlu1 %471  ;;  %v470_v5 = vpop.permute.xlu0 %469 }
  0xa2   : > { %v558_v4 = vsel %vm550_vm4, %v549_v60, %v472_v63  ;;  %v583_v6 = vrot.slane %v576_v57, %v2105_v52  ;;  %v575_v0 = vrot.slane %v568_v62, %v2105_v52  ;;  %v556_v8 = vsel %vm550_vm4, %v547_v51, %v470_v5 }
  0xa3   : > { %v563_v7 = vsel %vm559_vm5, %v558_v4, %v472_v63  ;;  %v562_v10 = vsel %vm559_vm5, %v556_v8, %v470_v5  ;;  %v827_v63 = vld [vmem:[#allocation2 + $0x4] sm:$0x7]  ;;  %v836_v8 = vld [vmem:[#allocation2 + $0x10] sm:$0x7]  ;;  %1219 = vmatpush1.bf16.msra.mxu1 %v1898_v28  ;;  %vm1356_vm4 = vcmask 1041409   ;;  %vm1358_vm5 = vcmask 1042434  }
  0xa4   : > { %v592_v9 = vcombine.low %v563_v7, %v512_v59  ;;  %v584_v2 = vcombine.low %v562_v10, %v505_v3  ;;  %v625_v13 = vcombine.low %v575_v0, %v583_v6  ;;  %v833_v6 = vld [vmem:[#allocation2 + $0xc] sm:$0x7]  ;;  %v830_v7 = vld [vmem:[#allocation2 + $0x8] sm:$0x7]  ;;  %1220 = vmatprep.subr.bf16.mxu1 %v1932_v1 }
  0xa6   : > { %v599_v11 = vrot.slane %v592_v9, %v2105_v52  ;;  %v591_v12 = vrot.slane %v584_v2, %v2105_v52  ;;  %v633_v15 = vrot.slane %v625_v13, %v2105_v52 }
  0xa8   : > { %v626_v14 = vcombine.low %v591_v12, %v599_v11 }
  0xaa   : > { %v640_v16 = vrot.slane %v626_v14, %v2105_v52 }
  0xac   : > { %v642_v17 = vcombine.high %v633_v15, %v640_v16  ;;  %v641_v18 = vcombine.low %v633_v15, %v640_v16 }
  0xae   : > { %1736 = vmatprep.mubr.msk.bf16.mxu0 %vm513_vm6, %v642_v17 }
  0xaf   : > { %734 = vmatmul.mubr.bf16.vlgmr.msra.gmra.mrb[0].mxu0 %v641_v18 }
 0x182   : > { %v735_v32 = vpop.f32.mrb[0].mxu0 }
 0x183   : > { %v736_v33 = vadd.f32 %v1726_v31, %v735_v32  ;;  %v737_v34 = vpop.f32.mrb[1].mxu0 }
 0x184   : > { %v738_v35 = vpop.f32.mrb[2].mxu0 }
 0x185   : > { %v739_v36 = vadd.f32 %v1726_v31, %v738_v35  ;;  %v740_v37 = vpop.f32.mrb[3].mxu0  ;;  %v742_v38 = vmax.f32 %v736_v33, 0.0  ;;  %v1899_v31 = vld [vmem:[%s2426_s3 + $0x20] sm:$0xff]  }
 0x186   : > { %1221 = vmatpush1.bf16.msra.mxu1 %v1899_v31 }
 0x187   : > { %v743_v39 = vmax.f32 %v739_v36, 0.0  ;;  %1222 = vmatprep.subr.bf16.mxu1 %v1932_v1  ;;  %v1900_v36 = vld [vmem:[%s2426_s3 + $0x28] sm:$0xff]  }
 0x189   : > { %v744_v40 = vpack.c.bf16 %v743_v39, %v742_v38  ;;  %v1737_v41 = vpack.c.bf16 %v743_v39, %v743_v39 }
 0x18a   : > { %1223 = vmatpush1.bf16.msra.mxu1 %v1900_v36 }
 0x18b   : > { %v753_v42 = vrot.slane %v744_v40, %v2105_v52  ;;  %v760_v43 = vrot.slane %v1737_v41, %v2105_v52  ;;  %1224 = vmatprep.subr.bf16.mxu1 %v1932_v1  ;;  %v1901_v41 = vld [vmem:[%s2426_s3 + $0x30] sm:$0xff]  }
 0x18d   : > { %v761_v44 = vcombine.high %v753_v42, %v753_v42  ;;  %v762_v45 = vcombine.high %v760_v43, %v760_v43  ;;  %v769_v46 = vrot.slane %v753_v42, %v2105_v52  ;;  %v783_v47 = vrot.slane %v760_v43, %v2105_v52 }
 0x18e   : > { %1225 = vmatpush1.bf16.msra.mxu1 %v1901_v41 }
 0x18f   : > { %v776_v48 = vrot.slane %v761_v44, %v2105_v52  ;;  %v790_v49 = vrot.slane %v762_v45, %v2105_v52  ;;  %v792_v50 = vshrl.u32 %v769_v46, 16  ;;  %v806_v53 = vshrl.u32 %v783_v47, 16  ;;  %1226 = vmatprep.subr.bf16.mxu1 %v1932_v1  ;;  %v1902_v45 = vld [vmem:[%s2426_s3 + $0x38] sm:$0xff]  }
 0x190   : > { %v795_v56 = vshll.u32 %v769_v46, 16  ;;  %v809_v61 = vshll.u32 %v783_v47, 16 }
 0x191   : > { %v794_v55 = vrot.slane %v792_v50, 7  ;;  %v799_v57 = vshrl.u32 %v776_v48, 16  ;;  %v813_v58 = vshrl.u32 %v790_v49, 16  ;;  %v802_v59 = vshll.u32 %v776_v48, 16  ;;  %v1903_v48 = vld [vmem:[%s2426_s3 + $0x40] sm:$0xff]   ;;  %v1904_v50 = vld [vmem:[%s2426_s3 + $0x48] sm:$0xff]  }
 0x192   : > { %v808_v60 = vrot.slane %v806_v53, 7  ;;  %v816_v5 = vshll.u32 %v790_v49, 16  ;;  %1227 = vmatpush1.bf16.msra.mxu1 %v1902_v45  ;;  %v1905_v53 = vld [vmem:[%s2426_s3 + $0x50] ss:$0 sps:$4 sm:$0x11]  }
 0x193   : > { %v797_v3 = vor.u32 %v795_v56, %v794_v55  ;;  %v801_v51 = vrot.slane %v799_v57, 7  ;;  %v815_v4 = vrot.slane %v813_v58, 7  ;;  %1228 = vmatprep.subr.bf16.mxu1 %v1932_v1  ;;  %v1210_v57 = vsel %vm1208_vm10, %v1905_v53, 0 }
 0x194   : > { %v811_v0 = vor.u32 %v809_v61, %v808_v60  ;;  %v969_v58 = vrot.slane %v2143_v25, 1  ;;  %v889_v60 = vpop.permute.xlu0 %888 }
 0x195   : > { %v804_v9 = vor.u32 %v802_v59, %v801_v51  ;;  %v818_v10 = vor.u32 %v816_v5, %v815_v4  ;;  %v828_v2 = vsel %vm2161_vm9, %v797_v3, %v827_v63  ;;  %v2261_v59 = vpop.permute.xlu1 %952 }
 0x196   : > { %829 = vst [vmem:[#allocation2 + $0x4] sm:$0x7] %v828_v2  ;;  %v834_v11 = vsel %vm2161_vm9, %v811_v0, %v833_v6  ;;  %1229 = vmatpush1.bf16.msra.mxu1 %v1903_v48 }
 0x197   : > { %v831_v12 = vsel %vm2161_vm9, %v804_v9, %v830_v7  ;;  %835 = vst [vmem:[#allocation2 + $0xc] sm:$0x7] %v834_v11  ;;  %v837_v13 = vsel %vm2161_vm9, %v818_v10, %v836_v8  ;;  %1230 = vmatprep.subr.bf16.mxu1 %v1932_v1 }
 0x198   : > { %832 = vst [vmem:[#allocation2 + $0x8] sm:$0x7] %v831_v12  ;;  %838 = vst [vmem:[#allocation2 + $0x10] sm:$0x7] %v837_v13  ;;  %v901_v62 = vpop.permute.xlu0 %900 }
 0x199   : > { %v2263_v61 = vpop.permute.xlu1 %967 }
 0x19a   : > { %1231 = vmatpush1.bf16.msra.mxu1 %v1904_v50 }
 0x19b   : > { %1232 = vmatprep.subr.bf16.mxu1 %v1932_v1 }
 0x19d   : > { %v2173_v14 = vld [vmem:[#allocation2 + $0x4] sm:$0x7] }
 0x19e   : > { %v2175_v15 = vld [vmem:[#allocation2 + $0xc] sm:$0x7]  ;;  %v1739_v16 = vcombine.low %v2173_v14, %v2173_v14  ;;  %1233 = vmatpush1.bf16.msra.mxu1 %v1210_v57 }
 0x19f   : > { %v1741_v17 = vcombine.low %v2175_v15, %v2175_v15  ;;  %v2187_v22 = vld [vmem:[#allocation2 + $0x8] sm:$0x7]  ;;  %v2198_v26 = vld [vmem:[#allocation2 + $0x10] ss:$0 sps:$4 sm:$0x77]  }
 0x1a0   : > { %911 = vrot.lane.b32.xlu0 %v1739_v16, %s1942_s18  ;;  %v897_v18 = vrot.slane %v1739_v16, 1  ;;  %v1740_v23 = vcombine.low %v2187_v22, %v2187_v22  ;;  %v870_v30 = vshll.u32 %v1739_v16, 16  ;;  %v934_v34 = vrot.slane %v2198_v26, 1 }
 0x1a1   : > { %948 = vrot.lane.b32.xlu1 %v1741_v17, %s1939_s13  ;;  %v899_v20 = vrot.slane %v1741_v17, 1  ;;  %v884_v33 = vshll.u32 %v1741_v17, 16  ;;  %v868_v35 = vshrl.u32 %v1739_v16, 16  ;;  %v882_v40 = vshrl.u32 %v1741_v17, 16 }
 0x1a2   : > { %v898_v29 = vrot.slane %v1740_v23, 1  ;;  %v872_v32 = vrot.slane %v870_v30, 1  ;;  %v877_v39 = vshll.u32 %v1740_v23, 16  ;;  %v875_v44 = vshrl.u32 %v1740_v23, 16 }
 0x1a3   : > { %v886_v38 = vrot.slane %v884_v33, 1  ;;  %v922_v47 = vshll.u32 %v2198_v26, 16  ;;  %v920_v55 = vshrl.u32 %v2198_v26, 16 }
 0x1a4   : > { %915 = vrot.lane.b32.xlu0 %v1741_v17, %s1942_s18  ;;  %v873_v37 = vor.u32 %v872_v32, %v868_v35  ;;  %v879_v43 = vrot.slane %v877_v39, 1 }
 0x1a5   : > { %902 = vrot.lane.b32.xlu1 %v897_v18, %s1940_s14  ;;  %v887_v42 = vor.u32 %v886_v38, %v882_v40  ;;  %v924_v49 = vrot.slane %v922_v47, 1 }
 0x1a6   : > { %v880_v46 = vor.u32 %v879_v43, %v875_v44 }
 0x1a7   : > { %v925_v56 = vor.u32 %v924_v49, %v920_v55 }
 0x1a8   : > { %935 = vrot.lane.b32.xlu0 %v897_v18, %s1943_s21  ;;  %v981_v18 = vsel %vm978_vm11, %v2138_v19, %v889_v60 }
 0x1a9   : > { %906 = vrot.lane.b32.xlu1 %v899_v20, %s1940_s14 }
 0x1ac   : > { %939 = vrot.lane.b32.xlu0 %v899_v20, %s1943_s21 }
 0x1ad   : > { %913 = vrot.lane.b32.xlu1 %v1740_v23, %s1942_s18 }
 0x1b0   : > { %946 = vrot.lane.b32.xlu0 %v1740_v23, %s1939_s13  ;;  %v993_v23 = vsel %vm991_vm12, %v981_v18, %v901_v62 }
 0x1b1   : > { %917 = vrot.lane.b32.xlu1 %v2198_v26, %s1942_s18 }
 0x1b4   : > { %950 = vrot.lane.b32.xlu0 %v2198_v26, %s1939_s13 }
 0x1b5   : > { %972 = vrot.lane.b32.xlu1 %v899_v20, %s1944_s9 }
 0x1b8   : > { %904 = vrot.lane.b32.xlu0 %v898_v29, %s1940_s14  ;;  %s1945_s14 = smov 72  }
 0x1b9   : > { %937 = vrot.lane.b32.xlu1 %v898_v29, %s1943_s21 }
 0x1bc   : > { %970 = vrot.lane.b32.xlu0 %v898_v29, %s1944_s9 }
 0x1bd   : > { %941 = vrot.lane.b32.xlu1 %v934_v34, %s1943_s21 }
 0x1c0   : > { %926 = vrot.lane.b32.xlu0 %v873_v37, %s1945_s14 }
 0x1c1   : > { %890 = vrot.lane.b32.xlu1 %v873_v37, %s1938_s10 }
 0x1c4   : > { %930 = vrot.lane.b32.xlu0 %v887_v42, %s1945_s14 }
 0x1c5   : > { %894 = vrot.lane.b32.xlu1 %v887_v42, %s1938_s10 }
 0x1c8   : > { %892 = vrot.lane.b32.xlu0 %v880_v46, %s1938_s10 }
 0x1c9   : > { %963 = vrot.lane.b32.xlu1 %v887_v42, %s1941_s15 }
 0x1cc   : > { %961 = vrot.lane.b32.xlu0 %v880_v46, %s1941_s15 }
 0x1cd   : > { %928 = vrot.lane.b32.xlu1 %v880_v46, %s1945_s14 }
 0x1d0   : > { %965 = vrot.lane.b32.xlu0 %v925_v56, %s1941_s15 }
 0x1d1   : > { %932 = vrot.lane.b32.xlu1 %v925_v56, %s1945_s14  ;;  %s1770_s14 = sshll.u32 %s2438_s24, 5 }
 0x1d2   : > { %s2353_s19 = scalar_lea.vmem %s2430_s7, %s1770_s14 }
 0x1d4   : > { %974 = vrot.lane.b32.xlu0 %v934_v34, %s1944_s9 }
 0x1d5   : > { %976 = vrot.lane.b32.xlu1 %v969_v58, %s1944_s9 }
 0x212   : > { %v912_v63 = vpop.permute.xlu0 %911 }
 0x213   : > { %v949_v3 = vpop.permute.xlu1 %948  ;;  %v1002_v26 = vsel %vm1000_vm13, %v993_v23, %v912_v63 }
 0x216   : > { %v916_v51 = vpop.permute.xlu0 %915 }
 0x217   : > { %v903_v4 = vpop.permute.xlu1 %902 }
 0x21a   : > { %v936_v5 = vpop.permute.xlu0 %935 }
 0x21b   : > { %v907_v6 = vpop.permute.xlu1 %906 }
 0x21e   : > { %v940_v0 = vpop.permute.xlu0 %939 }
 0x21f   : > { %v914_v7 = vpop.permute.xlu1 %913 }
 0x222   : > { %v947_v25 = vpop.permute.xlu0 %946 }
 0x223   : > { %v918_v8 = vpop.permute.xlu1 %917 }
 0x226   : > { %v951_v9 = vpop.permute.xlu0 %950 }
 0x227   : > { %v973_v10 = vpop.permute.xlu1 %972 }
 0x22a   : > { %v905_v2 = vpop.permute.xlu0 %904 }
 0x22b   : > { %v938_v11 = vpop.permute.xlu1 %937 }
 0x22e   : > { %v971_v12 = vpop.permute.xlu0 %970 }
 0x22f   : > { %v942_v13 = vpop.permute.xlu1 %941 }
 0x232   : > { %v927_v16 = vpop.permute.xlu0 %926 }
 0x233   : > { %v891_v17 = vpop.permute.xlu1 %890  ;;  %v1011_v28 = vsel %vm1009_vm14, %v1002_v26, %v927_v16 }
 0x234   : > { %v984_v24 = vsel %vm978_vm11, %v2173_v14, %v891_v17  ;;  %v1020_v14 = vsel %vm1018_vm15, %v1011_v28, %v936_v5 }
 0x235   : > { %v995_v30 = vsel %vm991_vm12, %v984_v24, %v903_v4 }
 0x236   : > { %v931_v20 = vpop.permute.xlu0 %930  ;;  %v1004_v35 = vsel %vm1000_vm13, %v995_v30, %v914_v7 }
 0x237   : > { %v895_v21 = vpop.permute.xlu1 %894 }
 0x238   : > { %v990_v32 = vsel %vm978_vm11, %v2175_v15, %v895_v21  ;;  %v1029_v15 = vsel %vm1027_vm0, %v1020_v14, %v947_v25 }
 0x239   : > { %v999_v37 = vsel %vm991_vm12, %v990_v32, %v907_v6 }
 0x23a   : > { %v893_v27 = vpop.permute.xlu0 %892  ;;  %v1008_v46 = vsel %vm1000_vm13, %v999_v37, %v918_v8  ;;  %v1952_v37 = vmov 6  }
 0x23b   : > { %v964_v29 = vpop.permute.xlu1 %963  ;;  %v987_v19 = vsel %vm978_vm11, %v2187_v22, %v893_v27 }
 0x23c   : > { %v997_v31 = vsel %vm991_vm12, %v987_v19, %v905_v2  ;;  %v1049_v44 = vsel %vm513_vm6, %v964_v29, %v973_v10  ;;  %v1757_v19 = vld [vmem:[%s2429_s6] ss:$0 sm:$0xff] }
 0x23d   : > { %v1006_v33 = vsel %vm1000_vm13, %v997_v31, %v916_v51 }
 0x23e   : > { %v962_v34 = vpop.permute.xlu0 %961  ;;  %v1015_v38 = vsel %vm1009_vm14, %v1006_v33, %v931_v20 }
 0x23f   : > { %v929_v36 = vpop.permute.xlu1 %928  ;;  %v1038_v41 = vsel %vm1036_vm1, %v1029_v15, %v962_v34  ;;  %v1047_v42 = vsel %vm513_vm6, %v962_v34, %v971_v12  ;;  %v1024_v48 = vsel %vm1018_vm15, %v1015_v38, %v940_v0  ;;  %v1946_v12 = vmov 0.0  }
 0x240   : > { %v1013_v22 = vsel %vm1009_vm14, %v1004_v35, %v929_v36  ;;  %v1062_v53 = vcombine.low %v1038_v41, %v1047_v42  ;;  %v1033_v56 = vsel %vm1027_vm0, %v1024_v48, %v951_v9  ;;  %1774 = vmatprep.subr.bf16.mxu0 %v1946_v12  ;;  %1778 = vmatprep.mubr.msk.bf16.mxu0 %vm1947_vm3, %v1946_v12  ;;  %v1949_v34 = vmov 3  }
 0x241   : > { %v1022_v39 = vsel %vm1018_vm15, %v1013_v22, %v938_v11  ;;  %v1950_v35 = vmov 2   ;;  %v1951_v36 = vmov 4   ;;  %v1953_v38 = vmov 5  }
 0x242   : > { %v1031_v40 = vsel %vm1027_vm0, %v1022_v39, %v949_v3  ;;  %v966_v43 = vpop.permute.xlu0 %965  ;;  %v1069_v6 = vrot.slane %v1062_v53, %v2105_v52  ;;  %v1954_v39 = vmov 7  }
 0x243   : > { %v1040_v45 = vsel %vm1036_vm1, %v1031_v40, %v964_v29  ;;  %v933_v47 = vpop.permute.xlu1 %932  ;;  %v1042_v60 = vsel %vm1036_vm1, %v1033_v56, %v966_v43  ;;  %v1948_v29 = vmov 1  }
 0x244   : > { %v1017_v49 = vsel %vm1009_vm14, %v1008_v46, %v933_v47  ;;  %v1070_v50 = vcombine.low %v1040_v45, %v1049_v44  ;;  %1831 = vset.pattern.permute.xlu1 %v1948_v29 }
 0x245   : > { %v1026_v55 = vsel %vm1018_vm15, %v1017_v49, %v942_v13  ;;  %v1907_v13 = vld [vmem:[%s2428_s5 + $0x8] ss:$0 sps:$4 sm:$0x11]  }
 0x246   : > { %v1035_v57 = vsel %vm1027_vm0, %v1026_v55, %v2261_v59  ;;  %v975_v58 = vpop.permute.xlu0 %974  ;;  %v1077_v51 = vrot.slane %v1070_v50, %v2105_v52  ;;  %v1279_v16 = vsel %vm1208_vm10, %v1907_v13, 0 }
 0x247   : > { %v1044_v62 = vsel %vm1036_vm1, %v1035_v57, %v2263_v61  ;;  %v977_v63 = vpop.permute.xlu1 %976  ;;  %v1051_v3 = vsel %vm513_vm6, %v966_v43, %v975_v58 }
 0x248   : > { %v1053_v4 = vsel %vm513_vm6, %v2263_v61, %v977_v63  ;;  %v1078_v5 = vcombine.low %v1042_v60, %v1051_v3  ;;  %v1122_v25 = vcombine.low %v1069_v6, %v1077_v51  ;;  %v1906_v61 = vld [vmem:[%s2428_s5] sm:$0xff]   ;;  %vm1360_vm6 = vcmask 1043459  }
 0x249   : > { %v1086_v0 = vcombine.low %v1044_v62, %v1053_v4  ;;  %1775 = vmatpush3.bf16.msra.mxu0 %v1906_v61 }
 0x24a   : > { %v1085_v59 = vrot.slane %v1078_v5, %v2105_v52  ;;  %v1130_v9 = vrot.slane %v1122_v25, %v2105_v52  ;;  %1776 = vmatprep.subr.bf16.mxu0 %v1946_v12 }
 0x24b   : > { %v1093_v7 = vrot.slane %v1086_v0, %v2105_v52 }
 0x24d   : > { %v1123_v8 = vcombine.low %v1085_v59, %v1093_v7  ;;  %1777 = vmatpush3.bf16.msra.mxu0 %v1279_v16 }
 0x24f   : > { %v1137_v10 = vrot.slane %v1123_v8, %v2105_v52  ;;  %v1744_v52 = vld [vmem:[%s2427_s4] ss:$0 sm:$0xff] }
 0x251   : > { %v1139_v2 = vcombine.high %v1130_v9, %v1137_v10  ;;  %v1138_v11 = vcombine.low %v1130_v9, %v1137_v10 }
 0x253   : > { %1756 = vmatprep.mubr.msk.bf16.mxu1 %vm1204_vm2, %v1139_v2 }
 0x254   : > { %1245 = vmatmul.mubr.bf16.vlgmr.msra.gmra.mrb[0].mxu1 %v1138_v11 }
 0x327   : > { %v1246_v17 = vpop.f32.mrb[0].mxu1 }
 0x328   : > { %v1247_v18 = vadd.f32 %v1744_v52, %v1246_v17  ;;  %v1248_v20 = vpop.f32.mrb[1].mxu1 }
 0x329   : > { %v1249_v21 = vpop.f32.mrb[2].mxu1 }
 0x32a   : > { %v1250_v23 = vadd.f32 %v1744_v52, %v1249_v21  ;;  %v1251_v24 = vpop.f32.mrb[3].mxu1  ;;  %v1253_v26 = vmax.f32 %v1247_v18, 0.0 }
 0x32c   : > { %v1254_v27 = vmax.f32 %v1250_v23, 0.0 }
 0x32e   : > { %v1255_v28 = vpack.c.bf16 %v1254_v27, %v1253_v26 }
 0x330   : > { %1779 = vmatmul.mubr.msk.bf16.vlgmr.msra.gmra.mrb[4].mxu0 %vm978_vm11, %v1255_v28 }
 0x403   : > { %v1315_v30 = vpop.f32.mrb[4].mxu0 }
 0x404   : > { %v1316_v31 = vadd.f32 %v1757_v19, %v1315_v30  ;;  %v1780_v32 = vpop.f32.mrb[5].mxu0 }
 0x405   : > { %v1318_v33 = vpop.f32.mrb[6].mxu0 }
 0x406   : > { %1366 = vperm.xlu1 %1831, %v1316_v31   ;;  %1327 = vperm.xlu0 %1830, %v1316_v31   ;;  %v1781_v14 = vpop.f32.mrb[7].mxu0  ;;  %v1324_v22 = vcombine.high %v1316_v31, %v1316_v31  ;;  %v1319_v15 = vadd.f32 %v1757_v19, %v1318_v33 }
 0x408   : > { %v1325_v40 = vcombine.high %v1319_v15, %v1319_v15 }
 0x40a   : > { %1833 = vset.pattern.permute.xlu1 %v1949_v34  ;;  %1832 = vset.pattern.permute.xlu0 %v1950_v35 }
 0x40b   : > { %1434 = vperm.xlu1 %1833, %v1316_v31   ;;  %1400 = vperm.xlu0 %1832, %v1316_v31  }
 0x40f   : > { %1834 = vset.pattern.permute.xlu1 %v1951_v36  ;;  %1836 = vset.pattern.permute.xlu0 %v1952_v37 }
 0x410   : > { %1468 = vperm.xlu1 %1834, %v1316_v31   ;;  %1536 = vperm.xlu0 %1836, %v1316_v31  }
 0x414   : > { %1835 = vset.pattern.permute.xlu1 %v1953_v38  ;;  %1839 = vset.pattern.permute.xlu0 %v1948_v29 }
 0x415   : > { %1502 = vperm.xlu1 %1835, %v1316_v31   ;;  %1369 = vperm.xlu0 %1839, %v1324_v22  }
 0x419   : > { %1837 = vset.pattern.permute.xlu1 %v1954_v39  ;;  %1842 = vset.pattern.permute.xlu0 %v1949_v34 }
 0x41a   : > { %1570 = vperm.xlu1 %1837, %v1316_v31   ;;  %1437 = vperm.xlu0 %1842, %v1324_v22  }
 0x41e   : > { %1838 = vset.pattern.permute.xlu1 %v1932_v1  ;;  %1844 = vset.pattern.permute.xlu0 %v1951_v36 }
 0x41f   : > { %1471 = vperm.xlu0 %1844, %v1324_v22   ;;  %1330 = vperm.xlu1 %1838, %v1324_v22  }
 0x423   : > { %1847 = vset.pattern.permute.xlu0 %v1954_v39  ;;  %1333 = vperm.xlu1 %1838, %v1319_v15  }
 0x424   : > { %1573 = vperm.xlu0 %1847, %v1324_v22  }
 0x427   : > { %1840 = vset.pattern.permute.xlu1 %v1948_v29 }
 0x428   : > { %1850 = vset.pattern.permute.xlu0 %v1952_v37  ;;  %1372 = vperm.xlu1 %1840, %v1319_v15  }
 0x429   : > { %1542 = vperm.xlu0 %1850, %v1319_v15  }
 0x42c   : > { %1841 = vset.pattern.permute.xlu1 %v1950_v35 }
 0x42d   : > { %1852 = vset.pattern.permute.xlu0 %v1932_v1  ;;  %1403 = vperm.xlu1 %1841, %v1324_v22  }
 0x42e   : > { %1336 = vperm.xlu0 %1852, %v1325_v40  }
 0x431   : > { %1406 = vperm.xlu1 %1841, %v1319_v15  }
 0x432   : > { %1854 = vset.pattern.permute.xlu0 %v1950_v35 }
 0x433   : > { %1409 = vperm.xlu0 %1854, %v1325_v40  }
 0x435   : > { %1843 = vset.pattern.permute.xlu1 %v1949_v34 }
 0x436   : > { %1440 = vperm.xlu1 %1843, %v1319_v15  }
 0x437   : > { %1856 = vset.pattern.permute.xlu0 %v1951_v36 }
 0x438   : > { %1477 = vperm.xlu0 %1856, %v1325_v40  }
 0x43a   : > { %1845 = vset.pattern.permute.xlu1 %v1953_v38 }
 0x43b   : > { %1505 = vperm.xlu1 %1845, %v1324_v22  }
 0x43c   : > { %1859 = vset.pattern.permute.xlu0 %v1954_v39 }
 0x43d   : > { %1579 = vperm.xlu0 %1859, %v1325_v40  }
 0x43f   : > { %1846 = vset.pattern.permute.xlu1 %v1952_v37 }
 0x440   : > { %1539 = vperm.xlu1 %1846, %v1324_v22  }
 0x444   : > { %1848 = vset.pattern.permute.xlu1 %v1951_v36 }
 0x445   : > { %1474 = vperm.xlu1 %1848, %v1319_v15  }
 0x449   : > { %1849 = vset.pattern.permute.xlu1 %v1953_v38 }
 0x44a   : > { %1508 = vperm.xlu1 %1849, %v1319_v15  }
 0x44e   : > { %1851 = vset.pattern.permute.xlu1 %v1954_v39 }
 0x44f   : > { %1576 = vperm.xlu1 %1851, %v1319_v15  }
 0x453   : > { %1853 = vset.pattern.permute.xlu1 %v1948_v29 }
 0x454   : > { %1375 = vperm.xlu1 %1853, %v1325_v40  }
 0x458   : > { %1855 = vset.pattern.permute.xlu1 %v1949_v34 }
 0x459   : > { %1443 = vperm.xlu1 %1855, %v1325_v40  }
 0x45d   : > { %1857 = vset.pattern.permute.xlu1 %v1953_v38 }
 0x45e   : > { %1511 = vperm.xlu1 %1857, %v1325_v40  }
 0x462   : > { %1858 = vset.pattern.permute.xlu1 %v1952_v37 }
 0x463   : > { %1545 = vperm.xlu1 %1858, %v1325_v40  }
 0x485   : > { %v1367_v1 = vpop.permute.xlu1 %1366  ;;  %v1328_v41 = vpop.permute.xlu0 %1327 }
 0x486   : > { %v1380_v42 = vrot.slane %v1367_v1, %v2059_v54  ;;  %v1343_v8 = vrot.slane %v1328_v41, %v2059_v54 }
 0x48a   : > { %v1435_v43 = vpop.permute.xlu1 %1434  ;;  %v1401_v44 = vpop.permute.xlu0 %1400 }
 0x48b   : > { %v1448_v45 = vrot.slane %v1435_v43, %v2059_v54  ;;  %v1414_v13 = vrot.slane %v1401_v44, %v2059_v54 }
 0x48f   : > { %v2332_v46 = vpop.permute.xlu1 %1468  ;;  %v1537_v47 = vpop.permute.xlu0 %1536 }
 0x490   : > { %v1550_v48 = vrot.slane %v1537_v47, %v2059_v54  ;;  %v1482_v37 = vrot.slane %v2332_v46, %v2059_v54 }
 0x494   : > { %v1503_v49 = vpop.permute.xlu1 %1502  ;;  %v1370_v50 = vpop.permute.xlu0 %1369 }
 0x495   : > { %v1516_v53 = vrot.slane %v1503_v49, %v2059_v54  ;;  %v1384_v55 = vrot.slane %v1370_v50, %v2059_v54 }
 0x497   : > { %v1393_v56 = vsel %vm1356_vm4, %v1384_v55, %v1380_v42 }
 0x499   : > { %v2338_v57 = vpop.permute.xlu1 %1570  ;;  %v1438_v58 = vpop.permute.xlu0 %1437 }
 0x49a   : > { %v1452_v60 = vrot.slane %v1438_v58, %v2059_v54  ;;  %v1584_v46 = vrot.slane %v2338_v57, %v2059_v54 }
 0x49c   : > { %v1461_v62 = vsel %vm1356_vm4, %v1452_v60, %v1448_v45 }
 0x49e   : > { %v1472_v63 = vpop.permute.xlu0 %1471  ;;  %v1331_v3 = vpop.permute.xlu1 %1330 }
 0x49f   : > { %v1347_v59 = vrot.slane %v1331_v3, %v2059_v54  ;;  %v1486_v14 = vrot.slane %v1472_v63, %v2059_v54 }
 0x4a1   : > { %v1357_v2 = vsel %vm1356_vm4, %v1347_v59, %v1343_v8  ;;  %v1495_v39 = vsel %vm1356_vm4, %v1486_v14, %v1482_v37 }
 0x4a2   : > { %v1334_v51 = vpop.permute.xlu1 %1333 }
 0x4a3   : > { %v1574_v4 = vpop.permute.xlu0 %1573  ;;  %v1351_v25 = vrot.slane %v1334_v51, %v2059_v54 }
 0x4a4   : > { %v1588_v43 = vrot.slane %v1574_v4, %v2059_v54 }
 0x4a5   : > { %v1359_v12 = vsel %vm1358_vm5, %v1351_v25, %v1357_v2 }
 0x4a6   : > { %v1597_v49 = vsel %vm1356_vm4, %v1588_v43, %v1584_v46 }
 0x4a7   : > { %v1373_v5 = vpop.permute.xlu1 %1372 }
 0x4a8   : > { %v1388_v6 = vrot.slane %v1373_v5, %v2059_v54  ;;  %v1543_v0 = vpop.permute.xlu0 %1542 }
 0x4a9   : > { %v1558_v33 = vrot.slane %v1543_v0, %v2059_v54 }
 0x4aa   : > { %v1394_v7 = vsel %vm1358_vm5, %v1388_v6, %v1393_v56 }
 0x4ac   : > { %v1404_v9 = vpop.permute.xlu1 %1403 }
 0x4ad   : > { %v1337_v10 = vpop.permute.xlu0 %1336  ;;  %v1418_v11 = vrot.slane %v1404_v9, %v2059_v54 }
 0x4ae   : > { %v1355_v61 = vrot.slane %v1337_v10, %v2059_v54 }
 0x4af   : > { %v1427_v18 = vsel %vm1356_vm4, %v1418_v11, %v1414_v13 }
 0x4b0   : > { %v1361_v16 = vsel %vm1360_vm6, %v1355_v61, %v1359_v12  ;;  %v1407_v52 = vpop.permute.xlu1 %1406 }
 0x4b1   : > { %1364 = vst.msk [vmem:[%s2353_s19] sm:$0xf] %vm1363_vm7, %v1361_v16  ;;  %v1422_v17 = vrot.slane %v1407_v52, %v2059_v54 }
 0x4b2   : > { %v1410_v20 = vpop.permute.xlu0 %1409 }
 0x4b3   : > { %v1428_v21 = vsel %vm1358_vm5, %v1422_v17, %v1427_v18  ;;  %v1426_v23 = vrot.slane %v1410_v20, %v2059_v54 }
 0x4b5   : > { %v1429_v24 = vsel %vm1360_vm6, %v1426_v23, %v1428_v21  ;;  %v1441_v26 = vpop.permute.xlu1 %1440 }
 0x4b6   : > { %1762 = vst.msk [vmem:[%s2353_s19 + $0x8] sm:$0xf] %vm1363_vm7, %v1429_v24  ;;  %v1456_v27 = vrot.slane %v1441_v26, %v2059_v54 }
 0x4b7   : > { %v1478_v35 = vpop.permute.xlu0 %1477 }
 0x4b8   : > { %v1462_v28 = vsel %vm1358_vm5, %v1456_v27, %v1461_v62  ;;  %v1494_v15 = vrot.slane %v1478_v35, %v2059_v54 }
 0x4ba   : > { %v1506_v29 = vpop.permute.xlu1 %1505 }
 0x4bb   : > { %v1520_v19 = vrot.slane %v1506_v29, %v2059_v54 }
 0x4bc   : > { %v1580_v45 = vpop.permute.xlu0 %1579 }
 0x4bd   : > { %v1529_v30 = vsel %vm1356_vm4, %v1520_v19, %v1516_v53  ;;  %v1596_v50 = vrot.slane %v1580_v45, %v2059_v54 }
 0x4bf   : > { %v1540_v31 = vpop.permute.xlu1 %1539 }
 0x4c0   : > { %v1554_v32 = vrot.slane %v1540_v31, %v2059_v54 }
 0x4c2   : > { %v1563_v34 = vsel %vm1356_vm4, %v1554_v32, %v1550_v48 }
 0x4c3   : > { %v1564_v36 = vsel %vm1358_vm5, %v1558_v33, %v1563_v34 }
 0x4c4   : > { %v1475_v22 = vpop.permute.xlu1 %1474 }
 0x4c5   : > { %v1490_v38 = vrot.slane %v1475_v22, %v2059_v54 }
 0x4c7   : > { %v1496_v40 = vsel %vm1358_vm5, %v1490_v38, %v1495_v39 }
 0x4c8   : > { %v1497_v1 = vsel %vm1360_vm6, %v1494_v15, %v1496_v40 }
 0x4c9   : > { %1764 = vst.msk [vmem:[%s2353_s19 + $0x10] sm:$0xf] %vm1363_vm7, %v1497_v1  ;;  %v1509_v41 = vpop.permute.xlu1 %1508 }
 0x4ca   : > { %v1524_v42 = vrot.slane %v1509_v41, %v2059_v54 }
 0x4cc   : > { %v1530_v44 = vsel %vm1358_vm5, %v1524_v42, %v1529_v30 }
 0x4ce   : > { %v1577_v47 = vpop.permute.xlu1 %1576 }
 0x4cf   : > { %v1592_v48 = vrot.slane %v1577_v47, %v2059_v54 }
 0x4d1   : > { %v1598_v53 = vsel %vm1358_vm5, %v1592_v48, %v1597_v49 }
 0x4d2   : > { %v1599_v55 = vsel %vm1360_vm6, %v1596_v50, %v1598_v53 }
 0x4d3   : > { %1767 = vst.msk [vmem:[%s2353_s19 + $0x1c] sm:$0xf] %vm1363_vm7, %v1599_v55  ;;  %v1376_v56 = vpop.permute.xlu1 %1375 }
 0x4d4   : > { %v1392_v58 = vrot.slane %v1376_v56, %v2059_v54 }
 0x4d6   : > { %v1395_v57 = vsel %vm1360_vm6, %v1392_v58, %v1394_v7 }
 0x4d7   : > { %1761 = vst.msk [vmem:[%s2353_s19 + $0x4] sm:$0xf] %vm1363_vm7, %v1395_v57 }
 0x4d8   : > { %v1444_v60 = vpop.permute.xlu1 %1443 }
 0x4d9   : > { %v1460_v62 = vrot.slane %v1444_v60, %v2059_v54 }
 0x4db   : > { %v1463_v63 = vsel %vm1360_vm6, %v1460_v62, %v1462_v28 }
 0x4dc   : > { %1763 = vst.msk [vmem:[%s2353_s19 + $0xc] sm:$0xf] %vm1363_vm7, %v1463_v63 }
 0x4dd   : > { %v1512_v3 = vpop.permute.xlu1 %1511 }
 0x4de   : > { %v1528_v51 = vrot.slane %v1512_v3, %v2059_v54 }
 0x4e0   : > { %v1531_v4 = vsel %vm1360_vm6, %v1528_v51, %v1530_v44 }
 0x4e1   : > { %1765 = vst.msk [vmem:[%s2353_s19 + $0x14] sm:$0xf] %vm1363_vm7, %v1531_v4 }
 0x4e2   : > { %v1546_v5 = vpop.permute.xlu1 %1545 }
 0x4e3   : > { %v1562_v6 = vrot.slane %v1546_v5, %v2059_v54 }
 0x4e5   : > { %v1565_v0 = vsel %vm1360_vm6, %v1562_v6, %v1564_v36 }
 0x4e6   : > { %1766 = vst.msk [vmem:[%s2353_s19 + $0x18] sm:$0xf] %vm1363_vm7, %v1565_v0 }
 0x4e7 PF: > { %s17_s26 = sadd.s32 1, %s1930_s26   ;;  %s2433_s24 = smov %s1926_s25 }
 0x4e8   : > { %p14_p5 = scmp.ge.s32.totalorder %s17_s26, 4   ;;  %s2434_s25 = smov %s2436_s27 }
 0x4ea   :  { %16 = sbr.rel (!%p14_p5) target bundleno = 2 (0x2), region = 93 }

</bundles_post_ra>
